<compile_context>
chip_gen: v7x
topology: tpu7x:2x2x1
jax: 0.10.0
libtpu: 0.0.40
codegen_flags: <defaults>
</compile_context>

<pallas_src>
import functools

import jax
import jax.numpy as jnp
import numpy as np
from jax.experimental import pallas as pl
from jax.experimental.pallas import tpu as pltpu

BN_EPS = 1e-5
LANE = 128


def _round_up(x, m):
    return (x + m - 1) // m * m


def _pick_tile_ho(ho, wo, max_rows):
    """Largest divisor of ho such that tile_ho * wo <= max_rows (>= 1)."""
    best = 1
    for t in range(1, ho + 1):
        if ho % t == 0 and t * wo <= max_rows:
            best = t
    return best


def _make_conv_stats_kernel(tile_ho, wo, stride, coutp):
    """Pass 1: conv tile (im2col formed in-register from the resident padded
    image) + per-channel sum / sum-of-squares accumulation."""

    def kernel(xp_ref, w_ref, conv_ref, stats_ref):
        # xp_ref   : (1, Hp, Wp, Cin)   bf16, whole padded image (resident per n)
        # w_ref    : (9, Cin, Coutp)    bf16, resident
        # conv_ref : (1, tile_ho, wo, Coutp) f32 output tile
        # stats_ref: (2, Coutp)         f32, resident accumulator (sum, sumsq)
        @pl.when((pl.program_id(0) == 0) & (pl.program_id(1) == 0))
        def _init():
            stats_ref[...] = jnp.zeros_like(stats_ref)

        h_idx = pl.program_id(1)
        row0 = h_idx * (tile_ho * stride)
        if (tile_ho * stride) % 8 == 0:
            row0 = pl.multiple_of(row0, 8)

        cin = xp_ref.shape[-1]
        acc = jnp.zeros((tile_ho * wo, coutp), jnp.float32)
        for kh in range(3):
            for kw in range(3):
                if stride == 1:
                    tap = xp_ref[0, pl.ds(row0 + kh, tile_ho), kw:kw + wo, :]
                else:
                    tap = xp_ref[0,
                                 pl.ds(row0 + kh, tile_ho, stride=stride),
                                 pl.ds(kw, wo, stride=stride),
                                 :]
                tap2d = tap.reshape(tile_ho * wo, cin)
                acc = acc + jnp.dot(tap2d, w_ref[kh * 3 + kw],
                                    preferred_element_type=jnp.float32)

        conv_ref[...] = acc.reshape(1, tile_ho, wo, coutp)
        stats_ref[0:1, :] += jnp.sum(acc, axis=0, keepdims=True)
        stats_ref[1:2, :] += jnp.sum(acc * acc, axis=0, keepdims=True)

    return kernel


def _bn_relu_kernel(conv_ref, scale_ref, bias_ref, out_ref):
    """Pass 2: y = max(conv * scale + bias, 0) with pre-folded BN affine."""
    scale = scale_ref[...].reshape(1, 1, 1, -1)
    bias = bias_ref[...].reshape(1, 1, 1, -1)
    y = conv_ref[...] * scale + bias
    out_ref[...] = jnp.maximum(y, 0.0).astype(out_ref.dtype)


@functools.partial(jax.jit, static_argnames=("stride", "max_tile_rows"))
def block_forward(x_nchw, conv_weight, gamma, beta, *, stride=1, max_tile_rows=512):
    """x_nchw: (N, Cin, H, W); conv_weight: (Cout, Cin, 3, 3) OIHW;
    gamma/beta: (Cout,). Returns NCHW output matching the PyTorch module."""
    n, cin, h, w = x_nchw.shape
    cout = conv_weight.shape[0]
    coutp = _round_up(cout, LANE)

    ho = (h + 2 - 3) // stride + 1
    wo = (w + 2 - 3) // stride + 1
    tile_ho = _pick_tile_ho(ho, wo, max_tile_rows)
    n_h_tiles = ho // tile_ho
    hp, wp = h + 2, w + 2

    # Layout glue (kept NCHW at the module boundary to match PyTorch).
    x_nhwc = jnp.transpose(x_nchw, (0, 2, 3, 1)).astype(jnp.bfloat16)
    xp = jnp.pad(x_nhwc, ((0, 0), (1, 1), (1, 1), (0, 0)))

    # OIHW -> (kh, kw, cin, cout) -> (9, cin, coutp), bf16 for the MXU.
    w_mat = jnp.transpose(conv_weight, (2, 3, 1, 0)).reshape(9, cin, cout)
    w_mat = jnp.pad(w_mat, ((0, 0), (0, 0), (0, coutp - cout))).astype(jnp.bfloat16)

    grid = (n, n_h_tiles)

    # Raise the scoped VMEM limit only when the per-step footprint needs it
    # (stays at the generation default for small shapes; capped for v7x).
    est = (2 * hp * wp * cin * 2            # double-buffered padded image (bf16)
           + 9 * cin * coutp * 2            # resident weights
           + 2 * tile_ho * wo * coutp * 4   # double-buffered conv tile (f32)
           + 2 * coutp * 4)                 # stats accumulator
    need = int(1.5 * est) + (2 << 20)
    vmem_limit = min(need, 64 << 20) if need > (32 << 20) else None

    # ---- Pass 1: conv + per-channel sum / sum-of-squares -------------------
    conv_p, stats = pl.pallas_call(
        _make_conv_stats_kernel(tile_ho, wo, stride, coutp),
        grid=grid,
        in_specs=[
            pl.BlockSpec((1, hp, wp, cin), lambda i, j: (i, 0, 0, 0)),
            pl.BlockSpec((9, cin, coutp), lambda i, j: (0, 0, 0)),
        ],
        out_specs=[
            pl.BlockSpec((1, tile_ho, wo, coutp), lambda i, j: (i, j, 0, 0)),
            pl.BlockSpec((2, coutp), lambda i, j: (0, 0)),
        ],
        out_shape=[
            jax.ShapeDtypeStruct((n, ho, wo, coutp), jnp.float32),
            jax.ShapeDtypeStruct((2, coutp), jnp.float32),
        ],
        compiler_params=pltpu.CompilerParams(
            dimension_semantics=("arbitrary", "arbitrary"),
            vmem_limit_bytes=vmem_limit,
        ),
    )(xp, w_mat)

    # ---- Finalize BN statistics and fold the affine (tiny (Cout,) math) ----
    m_total = jnp.float32(n * ho * wo)
    mean = stats[0] / m_total
    var = jnp.maximum(stats[1] / m_total - mean * mean, 0.0)
    inv_std = jax.lax.rsqrt(var + BN_EPS)
    gamma_p = jnp.pad(gamma.astype(jnp.float32), (0, coutp - cout))
    beta_p = jnp.pad(beta.astype(jnp.float32), (0, coutp - cout))
    scale = (gamma_p * inv_std).reshape(1, coutp)
    bias = (beta_p - mean * gamma_p * inv_std).reshape(1, coutp)

    # ---- Pass 2: normalize + ReLU (fully parallel) --------------------------
    out_p = pl.pallas_call(
        _bn_relu_kernel,
        grid=grid,
        in_specs=[
            pl.BlockSpec((1, tile_ho, wo, coutp), lambda i, j: (i, j, 0, 0)),
            pl.BlockSpec((1, coutp), lambda i, j: (0, 0)),
            pl.BlockSpec((1, coutp), lambda i, j: (0, 0)),
        ],
        out_specs=pl.BlockSpec((1, tile_ho, wo, coutp), lambda i, j: (i, j, 0, 0)),
        out_shape=jax.ShapeDtypeStruct((n, ho, wo, coutp), jnp.float32),
        compiler_params=pltpu.CompilerParams(
            dimension_semantics=("parallel", "parallel"),
            vmem_limit_bytes=vmem_limit,
        ),
    )(conv_p, scale, bias)

    out_nhwc = out_p[:, :, :, :cout]
    return jnp.transpose(out_nhwc, (0, 3, 1, 2))  # back to NCHW


def _reference_forward(x_nchw, conv_weight, gamma, beta, stride):
    """Pure-JAX reference (f32 conv on bf16-rounded operands, mirroring the
    MXU path) + training-mode BN + ReLU."""
    xr = x_nchw.astype(jnp.bfloat16).astype(jnp.float32)
    wr = conv_weight.astype(jnp.bfloat16).astype(jnp.float32)
    conv = jax.lax.conv_general_dilated(
        xr, wr, window_strides=(stride, stride), padding=((1, 1), (1, 1)),
        dimension_numbers=("NCHW", "OIHW", "NCHW"),
        precision=jax.lax.Precision.HIGHEST,
    )
    mean = jnp.mean(conv, axis=(0, 2, 3), keepdims=True)
    var = jnp.mean((conv - mean) ** 2, axis=(0, 2, 3), keepdims=True)
    y = (conv - mean) * jax.lax.rsqrt(var + BN_EPS)
    y = y * gamma.reshape(1, -1, 1, 1) + beta.reshape(1, -1, 1, 1)
    return jnp.maximum(y, 0.0)


if __name__ == "__main__":
    # Block(channels=(4, 8), stride=1); small deterministic shapes.
    N, CIN, COUT, H, W = 2, 4, 8, 16, 16
    STRIDE = 1

    key = jax.random.PRNGKey(0)
    kx, kw, kg, kb = jax.random.split(key, 4)
    x = jax.random.normal(kx, (N, CIN, H, W), dtype=jnp.float32)          # NCHW
    fan_in = CIN * 3 * 3
    conv_w = jax.random.uniform(
        kw, (COUT, CIN, 3, 3), dtype=jnp.float32,
        minval=-1.0 / np.sqrt(fan_in), maxval=1.0 / np.sqrt(fan_in))
    # Non-trivial affine to exercise the folded scale/bias path.
    gamma = 1.0 + 0.1 * jax.random.normal(kg, (COUT,), dtype=jnp.float32)
    beta = 0.1 * jax.random.normal(kb, (COUT,), dtype=jnp.float32)

    # max_tile_rows=128 -> tile_ho=8, grid=(2, 2): exercises the row tiling
    # and the cross-step stats accumulation even at this small test shape.
    out = block_forward(x, conv_w, gamma, beta, stride=STRIDE, max_tile_rows=128)
    out = jax.block_until_ready(out)

    ref = jax.block_until_ready(_reference_forward(x, conv_w, gamma, beta, STRIDE))
    np.testing.assert_allclose(np.asarray(out), np.asarray(ref), rtol=2e-3, atol=2e-3)
    assert out.shape == (N, COUT, H // STRIDE, W // STRIDE)

    print("KERNEL_OK")
</pallas_src>

<mosaic_0001>
module attributes {stable_mosaic.version = 11 : i64} {
  func.func @kernel(%arg0: i32, %arg1: i32, %arg2: memref<1x18x18x4xbf16, #tpu.memory_space<vmem>>, %arg3: memref<9x4x128xbf16, #tpu.memory_space<vmem>>, %arg4: memref<1x8x16x128xf32, #tpu.memory_space<vmem>>, %arg5: memref<2x128xf32, #tpu.memory_space<vmem>>) attributes {dimension_semantics = [#tpu.dimension_semantics<arbitrary>, #tpu.dimension_semantics<arbitrary>], iteration_bounds = array<i64: 2, 2>, scalar_prefetch = 0 : i64, scratch_operands = 0 : i64, tpu.core_type = #tpu.core_type<tc>, window_params = [{transform_indices = @transform_0, window_bounds = array<i64: 1, 18, 18, 4>}, {pipeline_mode = #tpu.pipeline_mode<synchronous>, transform_indices = @transform_1, window_bounds = array<i64: 9, 4, 128>}, {transform_indices = @transform_2, window_bounds = array<i64: 1, 8, 16, 128>}, {pipeline_mode = #tpu.pipeline_mode<synchronous>, transform_indices = @transform_3, window_bounds = array<i64: 2, 128>}]} {
    %c0_i32 = arith.constant 0 : i32
    %0 = arith.cmpi eq, %arg0, %c0_i32 : i32
    %c0_i32_0 = arith.constant 0 : i32
    %1 = arith.cmpi eq, %arg1, %c0_i32_0 : i32
    %2 = arith.andi %0, %1 : i1
    %3 = arith.extui %2 : i1 to i32
    %c0_i32_1 = arith.constant 0 : i32
    %4 = arith.cmpi ne, %3, %c0_i32_1 : i32
    scf.if %4 {
      %cst_77 = arith.constant 0.000000e+00 : f32
      %102 = vector.broadcast %cst_77 : f32 to vector<2x128xf32>
      %c0_78 = arith.constant 0 : index
      %c0_79 = arith.constant 0 : index
      %103 = vector.load %arg5[%c0_78, %c0_79] : memref<2x128xf32, #tpu.memory_space<vmem>>, vector<2x128xf32>
      tpu.vector_store %arg5[%c0_78, %c0_79], %102 {strides = array<i32>} : memref<2x128xf32, #tpu.memory_space<vmem>>, vector<2x128xf32>,
    } else {
    }
    %c8_i32 = arith.constant 8 : i32
    %5 = arith.muli %arg1, %c8_i32 : i32
    %6 = tpu.assume_multiple %5, 8 : i32
    %cst = arith.constant 0.000000e+00 : f32
    %7 = vector.broadcast %cst : f32 to vector<128x128xf32>
    %c0_i32_2 = arith.constant 0 : i32
    %8 = arith.addi %6, %c0_i32_2 : i32
    %c0 = arith.constant 0 : index
    %9 = arith.index_cast %8 : i32 to index
    %c0_3 = arith.constant 0 : index
    %c0_4 = arith.constant 0 : index
    %10 = vector.load %arg2[%c0, %9, %c0_3, %c0_4] : memref<1x18x18x4xbf16, #tpu.memory_space<vmem>>, vector<1x8x16x4xbf16>
    %11 = vector.shape_cast %10 : vector<1x8x16x4xbf16> to vector<8x16x4xbf16>
    %12 = vector.shape_cast %11 : vector<8x16x4xbf16> to vector<128x4xbf16>
    %c0_5 = arith.constant 0 : index
    %c0_6 = arith.constant 0 : index
    %c0_7 = arith.constant 0 : index
    %13 = vector.load %arg3[%c0_5, %c0_6, %c0_7] : memref<9x4x128xbf16, #tpu.memory_space<vmem>>, vector<1x4x128xbf16>
    %14 = vector.shape_cast %13 : vector<1x4x128xbf16> to vector<4x128xbf16>
    %cst_8 = arith.constant dense<0.000000e+00> : vector<128x128xf32>
    %15 = tpu.matmul %12, %14, %cst_8 {dimension_numbers = #tpu.dot_dimension_numbers<[1], [0], [0], [1], [0, 0, 1, 1], [], []>} : vector<128x4xbf16>, vector<4x128xbf16>, vector<128x128xf32> -> vector<128x128xf32>
    %16 = arith.addf %7, %15 : vector<128x128xf32>
    %c0_i32_9 = arith.constant 0 : i32
    %17 = arith.addi %6, %c0_i32_9 : i32
    %c0_10 = arith.constant 0 : index
    %18 = arith.index_cast %17 : i32 to index
    %c1 = arith.constant 1 : index
    %c0_11 = arith.constant 0 : index
    %19 = vector.load %arg2[%c0_10, %18, %c1, %c0_11] : memref<1x18x18x4xbf16, #tpu.memory_space<vmem>>, vector<1x8x16x4xbf16>
    %20 = vector.shape_cast %19 : vector<1x8x16x4xbf16> to vector<8x16x4xbf16>
    %21 = vector.shape_cast %20 : vector<8x16x4xbf16> to vector<128x4xbf16>
    %c1_12 = arith.constant 1 : index
    %c0_13 = arith.constant 0 : index
    %c0_14 = arith.constant 0 : index
    %22 = vector.load %arg3[%c1_12, %c0_13, %c0_14] : memref<9x4x128xbf16, #tpu.memory_space<vmem>>, vector<1x4x128xbf16>
    %23 = vector.shape_cast %22 : vector<1x4x128xbf16> to vector<4x128xbf16>
    %cst_15 = arith.constant dense<0.000000e+00> : vector<128x128xf32>
    %24 = tpu.matmul %21, %23, %cst_15 {dimension_numbers = #tpu.dot_dimension_numbers<[1], [0], [0], [1], [0, 0, 1, 1], [], []>} : vector<128x4xbf16>, vector<4x128xbf16>, vector<128x128xf32> -> vector<128x128xf32>
    %25 = arith.addf %16, %24 : vector<128x128xf32>
    %c0_i32_16 = arith.constant 0 : i32
    %26 = arith.addi %6, %c0_i32_16 : i32
    %c0_17 = arith.constant 0 : index
    %27 = arith.index_cast %26 : i32 to index
    %c2 = arith.constant 2 : index
    %c0_18 = arith.constant 0 : index
    %28 = vector.load %arg2[%c0_17, %27, %c2, %c0_18] : memref<1x18x18x4xbf16, #tpu.memory_space<vmem>>, vector<1x8x16x4xbf16>
    %29 = vector.shape_cast %28 : vector<1x8x16x4xbf16> to vector<8x16x4xbf16>
    %30 = vector.shape_cast %29 : vector<8x16x4xbf16> to vector<128x4xbf16>
    %c2_19 = arith.constant 2 : index
    %c0_20 = arith.constant 0 : index
    %c0_21 = arith.constant 0 : index
    %31 = vector.load %arg3[%c2_19, %c0_20, %c0_21] : memref<9x4x128xbf16, #tpu.memory_space<vmem>>, vector<1x4x128xbf16>
    %32 = vector.shape_cast %31 : vector<1x4x128xbf16> to vector<4x128xbf16>
    %cst_22 = arith.constant dense<0.000000e+00> : vector<128x128xf32>
    %33 = tpu.matmul %30, %32, %cst_22 {dimension_numbers = #tpu.dot_dimension_numbers<[1], [0], [0], [1], [0, 0, 1, 1], [], []>} : vector<128x4xbf16>, vector<4x128xbf16>, vector<128x128xf32> -> vector<128x128xf32>
    %34 = arith.addf %25, %33 : vector<128x128xf32>
    %c1_i32 = arith.constant 1 : i32
    %35 = arith.addi %6, %c1_i32 : i32
    %c0_23 = arith.constant 0 : index
    %36 = arith.index_cast %35 : i32 to index
    %c0_24 = arith.constant 0 : index
    %c0_25 = arith.constant 0 : index
    %37 = vector.load %arg2[%c0_23, %36, %c0_24, %c0_25] : memref<1x18x18x4xbf16, #tpu.memory_space<vmem>>, vector<1x8x16x4xbf16>
    %38 = vector.shape_cast %37 : vector<1x8x16x4xbf16> to vector<8x16x4xbf16>
    %39 = vector.shape_cast %38 : vector<8x16x4xbf16> to vector<128x4xbf16>
    %c3 = arith.constant 3 : index
    %c0_26 = arith.constant 0 : index
    %c0_27 = arith.constant 0 : index
    %40 = vector.load %arg3[%c3, %c0_26, %c0_27] : memref<9x4x128xbf16, #tpu.memory_space<vmem>>, vector<1x4x128xbf16>
    %41 = vector.shape_cast %40 : vector<1x4x128xbf16> to vector<4x128xbf16>
    %cst_28 = arith.constant dense<0.000000e+00> : vector<128x128xf32>
    %42 = tpu.matmul %39, %41, %cst_28 {dimension_numbers = #tpu.dot_dimension_numbers<[1], [0], [0], [1], [0, 0, 1, 1], [], []>} : vector<128x4xbf16>, vector<4x128xbf16>, vector<128x128xf32> -> vector<128x128xf32>
    %43 = arith.addf %34, %42 : vector<128x128xf32>
    %c1_i32_29 = arith.constant 1 : i32
    %44 = arith.addi %6, %c1_i32_29 : i32
    %c0_30 = arith.constant 0 : index
    %45 = arith.index_cast %44 : i32 to index
    %c1_31 = arith.constant 1 : index
    %c0_32 = arith.constant 0 : index
    %46 = vector.load %arg2[%c0_30, %45, %c1_31, %c0_32] : memref<1x18x18x4xbf16, #tpu.memory_space<vmem>>, vector<1x8x16x4xbf16>
    %47 = vector.shape_cast %46 : vector<1x8x16x4xbf16> to vector<8x16x4xbf16>
    %48 = vector.shape_cast %47 : vector<8x16x4xbf16> to vector<128x4xbf16>
    %c4 = arith.constant 4 : index
    %c0_33 = arith.constant 0 : index
    %c0_34 = arith.constant 0 : index
    %49 = vector.load %arg3[%c4, %c0_33, %c0_34] : memref<9x4x128xbf16, #tpu.memory_space<vmem>>, vector<1x4x128xbf16>
    %50 = vector.shape_cast %49 : vector<1x4x128xbf16> to vector<4x128xbf16>
    %cst_35 = arith.constant dense<0.000000e+00> : vector<128x128xf32>
    %51 = tpu.matmul %48, %50, %cst_35 {dimension_numbers = #tpu.dot_dimension_numbers<[1], [0], [0], [1], [0, 0, 1, 1], [], []>} : vector<128x4xbf16>, vector<4x128xbf16>, vector<128x128xf32> -> vector<128x128xf32>
    %52 = arith.addf %43, %51 : vector<128x128xf32>
    %c1_i32_36 = arith.constant 1 : i32
    %53 = arith.addi %6, %c1_i32_36 : i32
    %c0_37 = arith.constant 0 : index
    %54 = arith.index_cast %53 : i32 to index
    %c2_38 = arith.constant 2 : index
    %c0_39 = arith.constant 0 : index
    %55 = vector.load %arg2[%c0_37, %54, %c2_38, %c0_39] : memref<1x18x18x4xbf16, #tpu.memory_space<vmem>>, vector<1x8x16x4xbf16>
    %56 = vector.shape_cast %55 : vector<1x8x16x4xbf16> to vector<8x16x4xbf16>
    %57 = vector.shape_cast %56 : vector<8x16x4xbf16> to vector<128x4xbf16>
    %c5 = arith.constant 5 : index
    %c0_40 = arith.constant 0 : index
    %c0_41 = arith.constant 0 : index
    %58 = vector.load %arg3[%c5, %c0_40, %c0_41] : memref<9x4x128xbf16, #tpu.memory_space<vmem>>, vector<1x4x128xbf16>
    %59 = vector.shape_cast %58 : vector<1x4x128xbf16> to vector<4x128xbf16>
    %cst_42 = arith.constant dense<0.000000e+00> : vector<128x128xf32>
    %60 = tpu.matmul %57, %59, %cst_42 {dimension_numbers = #tpu.dot_dimension_numbers<[1], [0], [0], [1], [0, 0, 1, 1], [], []>} : vector<128x4xbf16>, vector<4x128xbf16>, vector<128x128xf32> -> vector<128x128xf32>
    %61 = arith.addf %52, %60 : vector<128x128xf32>
    %c2_i32 = arith.constant 2 : i32
    %62 = arith.addi %6, %c2_i32 : i32
    %c0_43 = arith.constant 0 : index
    %63 = arith.index_cast %62 : i32 to index
    %c0_44 = arith.constant 0 : index
    %c0_45 = arith.constant 0 : index
    %64 = vector.load %arg2[%c0_43, %63, %c0_44, %c0_45] : memref<1x18x18x4xbf16, #tpu.memory_space<vmem>>, vector<1x8x16x4xbf16>
    %65 = vector.shape_cast %64 : vector<1x8x16x4xbf16> to vector<8x16x4xbf16>
    %66 = vector.shape_cast %65 : vector<8x16x4xbf16> to vector<128x4xbf16>
    %c6 = arith.constant 6 : index
    %c0_46 = arith.constant 0 : index
    %c0_47 = arith.constant 0 : index
    %67 = vector.load %arg3[%c6, %c0_46, %c0_47] : memref<9x4x128xbf16, #tpu.memory_space<vmem>>, vector<1x4x128xbf16>
    %68 = vector.shape_cast %67 : vector<1x4x128xbf16> to vector<4x128xbf16>
    %cst_48 = arith.constant dense<0.000000e+00> : vector<128x128xf32>
    %69 = tpu.matmul %66, %68, %cst_48 {dimension_numbers = #tpu.dot_dimension_numbers<[1], [0], [0], [1], [0, 0, 1, 1], [], []>} : vector<128x4xbf16>, vector<4x128xbf16>, vector<128x128xf32> -> vector<128x128xf32>
    %70 = arith.addf %61, %69 : vector<128x128xf32>
    %c2_i32_49 = arith.constant 2 : i32
    %71 = arith.addi %6, %c2_i32_49 : i32
    %c0_50 = arith.constant 0 : index
    %72 = arith.index_cast %71 : i32 to index
    %c1_51 = arith.constant 1 : index
    %c0_52 = arith.constant 0 : index
    %73 = vector.load %arg2[%c0_50, %72, %c1_51, %c0_52] : memref<1x18x18x4xbf16, #tpu.memory_space<vmem>>, vector<1x8x16x4xbf16>
    %74 = vector.shape_cast %73 : vector<1x8x16x4xbf16> to vector<8x16x4xbf16>
    %75 = vector.shape_cast %74 : vector<8x16x4xbf16> to vector<128x4xbf16>
    %c7 = arith.constant 7 : index
    %c0_53 = arith.constant 0 : index
    %c0_54 = arith.constant 0 : index
    %76 = vector.load %arg3[%c7, %c0_53, %c0_54] : memref<9x4x128xbf16, #tpu.memory_space<vmem>>, vector<1x4x128xbf16>
    %77 = vector.shape_cast %76 : vector<1x4x128xbf16> to vector<4x128xbf16>
    %cst_55 = arith.constant dense<0.000000e+00> : vector<128x128xf32>
    %78 = tpu.matmul %75, %77, %cst_55 {dimension_numbers = #tpu.dot_dimension_numbers<[1], [0], [0], [1], [0, 0, 1, 1], [], []>} : vector<128x4xbf16>, vector<4x128xbf16>, vector<128x128xf32> -> vector<128x128xf32>
    %79 = arith.addf %70, %78 : vector<128x128xf32>
    %c2_i32_56 = arith.constant 2 : i32
    %80 = arith.addi %6, %c2_i32_56 : i32
    %c0_57 = arith.constant 0 : index
    %81 = arith.index_cast %80 : i32 to index
    %c2_58 = arith.constant 2 : index
    %c0_59 = arith.constant 0 : index
    %82 = vector.load %arg2[%c0_57, %81, %c2_58, %c0_59] : memref<1x18x18x4xbf16, #tpu.memory_space<vmem>>, vector<1x8x16x4xbf16>
    %83 = vector.shape_cast %82 : vector<1x8x16x4xbf16> to vector<8x16x4xbf16>
    %84 = vector.shape_cast %83 : vector<8x16x4xbf16> to vector<128x4xbf16>
    %c8 = arith.constant 8 : index
    %c0_60 = arith.constant 0 : index
    %c0_61 = arith.constant 0 : index
    %85 = vector.load %arg3[%c8, %c0_60, %c0_61] : memref<9x4x128xbf16, #tpu.memory_space<vmem>>, vector<1x4x128xbf16>
    %86 = vector.shape_cast %85 : vector<1x4x128xbf16> to vector<4x128xbf16>
    %cst_62 = arith.constant dense<0.000000e+00> : vector<128x128xf32>
    %87 = tpu.matmul %84, %86, %cst_62 {dimension_numbers = #tpu.dot_dimension_numbers<[1], [0], [0], [1], [0, 0, 1, 1], [], []>} : vector<128x4xbf16>, vector<4x128xbf16>, vector<128x128xf32> -> vector<128x128xf32>
    %88 = arith.addf %79, %87 : vector<128x128xf32>
    %89 = vector.shape_cast %88 : vector<128x128xf32> to vector<1x8x16x128xf32>
    %c0_63 = arith.constant 0 : index
    %c0_64 = arith.constant 0 : index
    %c0_65 = arith.constant 0 : index
    %c0_66 = arith.constant 0 : index
    %90 = vector.load %arg4[%c0_63, %c0_64, %c0_65, %c0_66] : memref<1x8x16x128xf32, #tpu.memory_space<vmem>>, vector<1x8x16x128xf32>
    tpu.vector_store %arg4[%c0_63, %c0_64, %c0_65, %c0_66], %89 {strides = array<i32>} : memref<1x8x16x128xf32, #tpu.memory_space<vmem>>, vector<1x8x16x128xf32>,
    %c0_67 = arith.constant 0 : index
    %c0_68 = arith.constant 0 : index
    %91 = vector.load %arg5[%c0_67, %c0_68] : memref<2x128xf32, #tpu.memory_space<vmem>>, vector<1x128xf32>
    %cst_69 = arith.constant dense<0.000000e+00> : vector<128xf32>
    %92 = vector.multi_reduction <add>, %88, %cst_69 [0] : vector<128x128xf32> to vector<128xf32>
    %93 = vector.shape_cast %92 : vector<128xf32> to vector<1x128xf32>
    %94 = arith.addf %91, %93 : vector<1x128xf32>
    %c0_70 = arith.constant 0 : index
    %c0_71 = arith.constant 0 : index
    %95 = vector.load %arg5[%c0_70, %c0_71] : memref<2x128xf32, #tpu.memory_space<vmem>>, vector<1x128xf32>
    tpu.vector_store %arg5[%c0_70, %c0_71], %94 {strides = array<i32>} : memref<2x128xf32, #tpu.memory_space<vmem>>, vector<1x128xf32>,
    %c1_72 = arith.constant 1 : index
    %c0_73 = arith.constant 0 : index
    %96 = vector.load %arg5[%c1_72, %c0_73] : memref<2x128xf32, #tpu.memory_space<vmem>>, vector<1x128xf32>
    %97 = arith.mulf %88, %88 : vector<128x128xf32>
    %cst_74 = arith.constant dense<0.000000e+00> : vector<128xf32>
    %98 = vector.multi_reduction <add>, %97, %cst_74 [0] : vector<128x128xf32> to vector<128xf32>
    %99 = vector.shape_cast %98 : vector<128xf32> to vector<1x128xf32>
    %100 = arith.addf %96, %99 : vector<1x128xf32>
    %c1_75 = arith.constant 1 : index
    %c0_76 = arith.constant 0 : index
    %101 = vector.load %arg5[%c1_75, %c0_76] : memref<2x128xf32, #tpu.memory_space<vmem>>, vector<1x128xf32>
    tpu.vector_store %arg5[%c1_75, %c0_76], %100 {strides = array<i32>} : memref<2x128xf32, #tpu.memory_space<vmem>>, vector<1x128xf32>,
    return
  }
  func.func @transform_0(%arg0: i32, %arg1: i32) -> (i32, i32, i32, i32) {
    %c0_i32 = arith.constant 0 : i32
    %c0_i32_0 = arith.constant 0 : i32
    %c0_i32_1 = arith.constant 0 : i32
    %c0_i32_2 = arith.constant 0 : i32
    return %arg0, %c0_i32, %c0_i32_0, %c0_i32_1 : i32, i32, i32, i32
  }
  func.func @transform_1(%arg0: i32, %arg1: i32) -> (i32, i32, i32) {
    %c0_i32 = arith.constant 0 : i32
    %c0_i32_0 = arith.constant 0 : i32
    %c0_i32_1 = arith.constant 0 : i32
    %c0_i32_2 = arith.constant 0 : i32
    return %c0_i32, %c0_i32_0, %c0_i32_1 : i32, i32, i32
  }
  func.func @transform_2(%arg0: i32, %arg1: i32) -> (i32, i32, i32, i32) {
    %c0_i32 = arith.constant 0 : i32
    %c0_i32_0 = arith.constant 0 : i32
    %c0_i32_1 = arith.constant 0 : i32
    return %arg0, %arg1, %c0_i32, %c0_i32_0 : i32, i32, i32, i32
  }
  func.func @transform_3(%arg0: i32, %arg1: i32) -> (i32, i32) {
    %c0_i32 = arith.constant 0 : i32
    %c0_i32_0 = arith.constant 0 : i32
    %c0_i32_1 = arith.constant 0 : i32
    return %c0_i32, %c0_i32_0 : i32, i32
  }
}

module attributes {stable_mosaic.version = 11 : i64} {
  func.func @_bn_relu_kernel(%arg0: i32, %arg1: i32, %arg2: memref<1x8x16x128xf32, #tpu.memory_space<vmem>>, %arg3: memref<1x128xf32, #tpu.memory_space<vmem>>, %arg4: memref<1x128xf32, #tpu.memory_space<vmem>>, %arg5: memref<1x8x16x128xf32, #tpu.memory_space<vmem>>) attributes {dimension_semantics = [#tpu.dimension_semantics<parallel>, #tpu.dimension_semantics<parallel>], iteration_bounds = array<i64: 2, 2>, scalar_prefetch = 0 : i64, scratch_operands = 0 : i64, tpu.core_type = #tpu.core_type<tc>, window_params = [{transform_indices = @transform_0, window_bounds = array<i64: 1, 8, 16, 128>}, {pipeline_mode = #tpu.pipeline_mode<synchronous>, transform_indices = @transform_1, window_bounds = array<i64: 1, 128>}, {pipeline_mode = #tpu.pipeline_mode<synchronous>, transform_indices = @transform_2, window_bounds = array<i64: 1, 128>}, {transform_indices = @transform_3, window_bounds = array<i64: 1, 8, 16, 128>}]} {
    %c0 = arith.constant 0 : index
    %c0_0 = arith.constant 0 : index
    %0 = vector.load %arg3[%c0, %c0_0] : memref<1x128xf32, #tpu.memory_space<vmem>>, vector<1x128xf32>
    %1 = vector.shape_cast %0 : vector<1x128xf32> to vector<1x1x1x128xf32>
    %c0_1 = arith.constant 0 : index
    %c0_2 = arith.constant 0 : index
    %2 = vector.load %arg4[%c0_1, %c0_2] : memref<1x128xf32, #tpu.memory_space<vmem>>, vector<1x128xf32>
    %3 = vector.shape_cast %2 : vector<1x128xf32> to vector<1x1x1x128xf32>
    %c0_3 = arith.constant 0 : index
    %c0_4 = arith.constant 0 : index
    %c0_5 = arith.constant 0 : index
    %c0_6 = arith.constant 0 : index
    %4 = vector.load %arg2[%c0_3, %c0_4, %c0_5, %c0_6] : memref<1x8x16x128xf32, #tpu.memory_space<vmem>>, vector<1x8x16x128xf32>
    %5 = vector.broadcast %1 : vector<1x1x1x128xf32> to vector<1x8x16x128xf32>
    %6 = arith.mulf %4, %5 : vector<1x8x16x128xf32>
    %7 = vector.broadcast %3 : vector<1x1x1x128xf32> to vector<1x8x16x128xf32>
    %8 = arith.addf %6, %7 : vector<1x8x16x128xf32>
    %cst = arith.constant 0.000000e+00 : f32
    %9 = vector.broadcast %cst : f32 to vector<1x8x16x128xf32>
    %10 = arith.maximumf %8, %9 : vector<1x8x16x128xf32>
    %c0_7 = arith.constant 0 : index
    %c0_8 = arith.constant 0 : index
    %c0_9 = arith.constant 0 : index
    %c0_10 = arith.constant 0 : index
    %11 = vector.load %arg5[%c0_7, %c0_8, %c0_9, %c0_10] : memref<1x8x16x128xf32, #tpu.memory_space<vmem>>, vector<1x8x16x128xf32>
    tpu.vector_store %arg5[%c0_7, %c0_8, %c0_9, %c0_10], %10 {strides = array<i32>} : memref<1x8x16x128xf32, #tpu.memory_space<vmem>>, vector<1x8x16x128xf32>,
    return
  }
  func.func @transform_0(%arg0: i32, %arg1: i32) -> (i32, i32, i32, i32) {
    %c0_i32 = arith.constant 0 : i32
    %c0_i32_0 = arith.constant 0 : i32
    %c0_i32_1 = arith.constant 0 : i32
    return %arg0, %arg1, %c0_i32, %c0_i32_0 : i32, i32, i32, i32
  }
  func.func @transform_1(%arg0: i32, %arg1: i32) -> (i32, i32) {
    %c0_i32 = arith.constant 0 : i32
    %c0_i32_0 = arith.constant 0 : i32
    %c0_i32_1 = arith.constant 0 : i32
    return %c0_i32, %c0_i32_0 : i32, i32
  }
  func.func @transform_2(%arg0: i32, %arg1: i32) -> (i32, i32) {
    %c0_i32 = arith.constant 0 : i32
    %c0_i32_0 = arith.constant 0 : i32
    %c0_i32_1 = arith.constant 0 : i32
    return %c0_i32, %c0_i32_0 : i32, i32
  }
  func.func @transform_3(%arg0: i32, %arg1: i32) -> (i32, i32, i32, i32) {
    %c0_i32 = arith.constant 0 : i32
    %c0_i32_0 = arith.constant 0 : i32
    %c0_i32_1 = arith.constant 0 : i32
    return %arg0, %arg1, %c0_i32, %c0_i32_0 : i32, i32, i32, i32
  }
}

</mosaic_0001>

<bundles_post_ra>
// kernel: block_forward.3
= control target key start
LH: loop header
LB: loop body
LE: loop exit
PB: predicated region body
PF: predicated region fallthrough
CT: control target
= control target key end

     0   :  { %s525_s12 = smov 0   ;;  %s527_s13 = smov 0   ;;  %s654_s0 = inlined_call_operand.vmem [shape: f32[2,16,16,128], index: 0, kind: input, shape index: {}]   ;;  %s655_s1 = inlined_call_operand.vmem [shape: f32[1,128], index: 1, kind: input, shape index: {}]   ;;  %s656_s2 = inlined_call_operand.vmem [shape: f32[1,128], index: 2, kind: input, shape index: {}]   ;;  %s657_s3 = inlined_call_operand.vmem [shape: f32[2,16,16,128], index: 3, kind: output, shape index: {}]  }
   0x1   :  { %s529_s14 = smov 0   ;;  %s531_s15 = smov 0  }
   0x2   :  { %s533_s16 = smov 0  }
   0x3 LB: > { %s22_s17 = sadd.s32 1, %s495_s14  ;;  %s25_s18 = sadd.s32 1, %s499_s15  ;;  %s503_s16 = sphi %s533_s16, %s13_s16   ;;  %s499_s15 = sphi %s531_s15, %s661_s15   ;;  %s495_s14 = sphi %s529_s14, %s660_s14   ;;  %s491_s13 = sphi %s527_s13, %s659_s13   ;;  %s487_s12 = sphi %s525_s12, %s658_s12  }
   0x4   : > { %p23_p0 = scmp.ge.s32.totalorder %s22_s17, 2  ;;  %p412_p1 = scmp.ge.s32.totalorder %s503_s16, 1 }
   0x5   : > { %p159_p2 = scmp.lt.s32.totalorder %s503_s16, 5 }
   0x6   : > { %s663_s17 = smov (%p23_p0, %s22_s17), 0  ;;  %s665_s18 = smov (!%p23_p0, %s25_s18), %s499_s15 }
   0x7   : > { %p160_p3 = pnand %p412_p1, %p159_p2  ;;  %p27_p4 = scmp.ge.s32.totalorder %s665_s18, 2 }
   0x8   : > { %s413_s19 = sshll.u32 (!%p160_p3), %s487_s12, 3  ;;  %p194_p5 = scmp.lt.s32.totalorder (!%p160_p3), %s491_s13, 1  ;;  %v558_v0 = vld [vmem:[%s655_s1] ss:$0 sm:$0xff] (!%p160_p3) }
   0x9   : > { %s667_s18 = smov (%p27_p4, %s665_s18), 0  ;;  %163 = sbr.rel (%p160_p3) target bundleno = 39 (0x27), region = 32 }
   0xa   : > { %p196_p6 = scmp.lt.s32.totalorder (!%p160_p3), %s413_s19, 15  ;;  %v568_v1 = vld [vmem:[%s656_s2] ss:$0 sm:$0xff] (!%p160_p3) }
  0x10   : > { %s669_s13 = smov (!%p194_p5, %s491_s13), 1  ;;  %s671_s19 = smov (!%p196_p6, %s413_s19), 15 }
  0x11   : > { %s415_s20 = sshll.u32 %s669_s13, 5  ;;  %s414_s21 = sshll.u32 %s671_s19, 1 }
  0x12   : > { %s200_s22 = sadd.s32 %s415_s20, %s414_s21 }
  0x13   : > { %s416_s23 = sshll.u32 %s200_s22, 3 }
  0x14   : > { %s563_s28 = scalar_lea.vmem %s654_s0, %s416_s23  ;;  %s591_s6 = scalar_lea.vmem %s657_s3, %s416_s23 }
  0x15   : > { %v217_v2 = vld [vmem:[%s563_s28] sm:$0xff]  ;;  %v218_v3 = vld [vmem:[%s563_s28 + $0x8] sm:$0xff]  ;;  %v219_v4 = vld [vmem:[%s563_s28 + $0x10] sm:$0xff] }
  0x16   : > { %v239_v5 = vmul.f32 %v558_v0, %v217_v2  ;;  %v240_v6 = vmul.f32 %v558_v0, %v218_v3  ;;  %v241_v7 = vmul.f32 %v558_v0, %v219_v4  ;;  %v220_v8 = vld [vmem:[%s563_s28 + $0x18] sm:$0xff]  ;;  %v221_v9 = vld [vmem:[%s563_s28 + $0x20] sm:$0xff]  ;;  %v222_v10 = vld [vmem:[%s563_s28 + $0x28] sm:$0xff] }
  0x17   : > { %v242_v11 = vmul.f32 %v558_v0, %v220_v8  ;;  %v243_v12 = vmul.f32 %v558_v0, %v221_v9  ;;  %v244_v13 = vmul.f32 %v558_v0, %v222_v10  ;;  %v223_v14 = vld [vmem:[%s563_s28 + $0x30] sm:$0xff]  ;;  %v224_v15 = vld [vmem:[%s563_s28 + $0x38] sm:$0xff]  ;;  %v225_v24 = vld [vmem:[%s563_s28 + $0x40] sm:$0xff] }
  0x18   : > { %v261_v16 = vadd.f32 %v568_v1, %v239_v5  ;;  %v262_v17 = vadd.f32 %v568_v1, %v240_v6  ;;  %v263_v18 = vadd.f32 %v568_v1, %v241_v7  ;;  %v245_v19 = vmul.f32 %v558_v0, %v223_v14  ;;  %v226_v25 = vld [vmem:[%s563_s28 + $0x48] sm:$0xff]  ;;  %v227_v26 = vld [vmem:[%s563_s28 + $0x50] sm:$0xff]  ;;  %v228_v31 = vld [vmem:[%s563_s28 + $0x58] sm:$0xff] }
  0x19   : > { %v264_v20 = vadd.f32 %v568_v1, %v242_v11  ;;  %v265_v21 = vadd.f32 %v568_v1, %v243_v12  ;;  %v266_v22 = vadd.f32 %v568_v1, %v244_v13  ;;  %v246_v23 = vmul.f32 %v558_v0, %v224_v15  ;;  %v229_v32 = vld [vmem:[%s563_s28 + $0x60] sm:$0xff]  ;;  %v230_v33 = vld [vmem:[%s563_s28 + $0x68] sm:$0xff]  ;;  %v231_v38 = vld [vmem:[%s563_s28 + $0x70] sm:$0xff] }
  0x1a   : > { %v277_v27 = vmax.f32 %v261_v16, 0.0  ;;  %v278_v28 = vmax.f32 %v262_v17, 0.0  ;;  %v279_v29 = vmax.f32 %v263_v18, 0.0  ;;  %v267_v30 = vadd.f32 %v568_v1, %v245_v19  ;;  %v232_v43 = vld [vmem:[%s563_s28 + $0x78] sm:$0xff] }
  0x1b   : > { %v280_v34 = vmax.f32 %v264_v20, 0.0  ;;  %v281_v35 = vmax.f32 %v265_v21, 0.0  ;;  %v282_v36 = vmax.f32 %v266_v22, 0.0  ;;  %v268_v37 = vadd.f32 %v568_v1, %v246_v23 }
  0x1c   : > { %293 = vst [vmem:[%s591_s6] sm:$0xff] %v277_v27  ;;  %294 = vst [vmem:[%s591_s6 + $0x8] sm:$0xff] %v278_v28  ;;  %v283_v39 = vmax.f32 %v267_v30, 0.0  ;;  %v247_v40 = vmul.f32 %v558_v0, %v225_v24  ;;  %v248_v41 = vmul.f32 %v558_v0, %v226_v25  ;;  %v249_v42 = vmul.f32 %v558_v0, %v227_v26 }
  0x1d   : > { %295 = vst [vmem:[%s591_s6 + $0x10] sm:$0xff] %v279_v29  ;;  %296 = vst [vmem:[%s591_s6 + $0x18] sm:$0xff] %v280_v34  ;;  %v284_v44 = vmax.f32 %v268_v37, 0.0  ;;  %v250_v45 = vmul.f32 %v558_v0, %v228_v31  ;;  %v251_v46 = vmul.f32 %v558_v0, %v229_v32  ;;  %v252_v47 = vmul.f32 %v558_v0, %v230_v33 }
  0x1e   : > { %297 = vst [vmem:[%s591_s6 + $0x20] sm:$0xff] %v281_v35  ;;  %298 = vst [vmem:[%s591_s6 + $0x28] sm:$0xff] %v282_v36  ;;  %v269_v48 = vadd.f32 %v568_v1, %v247_v40  ;;  %v270_v49 = vadd.f32 %v568_v1, %v248_v41  ;;  %v271_v50 = vadd.f32 %v568_v1, %v249_v42 }
  0x1f   : > { %299 = vst [vmem:[%s591_s6 + $0x30] sm:$0xff] %v283_v39  ;;  %v253_v51 = vmul.f32 %v558_v0, %v231_v38  ;;  %300 = vst [vmem:[%s591_s6 + $0x38] sm:$0xff] %v284_v44  ;;  %v272_v52 = vadd.f32 %v568_v1, %v250_v45  ;;  %v273_v53 = vadd.f32 %v568_v1, %v251_v46 }
  0x20   : > { %v274_v54 = vadd.f32 %v568_v1, %v252_v47  ;;  %v254_v55 = vmul.f32 %v558_v0, %v232_v43  ;;  %v285_v56 = vmax.f32 %v269_v48, 0.0  ;;  %v286_v57 = vmax.f32 %v270_v49, 0.0 }
  0x21   : > { %v287_v58 = vmax.f32 %v271_v50, 0.0  ;;  %v275_v59 = vadd.f32 %v568_v1, %v253_v51  ;;  %v288_v60 = vmax.f32 %v272_v52, 0.0  ;;  %v289_v61 = vmax.f32 %v273_v53, 0.0 }
  0x22   : > { %v290_v62 = vmax.f32 %v274_v54, 0.0  ;;  %v276_v63 = vadd.f32 %v568_v1, %v254_v55  ;;  %301 = vst [vmem:[%s591_s6 + $0x40] sm:$0xff] %v285_v56  ;;  %302 = vst [vmem:[%s591_s6 + $0x48] sm:$0xff] %v286_v57 }
  0x23   : > { %303 = vst [vmem:[%s591_s6 + $0x50] sm:$0xff] %v287_v58  ;;  %v291_v2 = vmax.f32 %v275_v59, 0.0  ;;  %304 = vst [vmem:[%s591_s6 + $0x58] sm:$0xff] %v288_v60 }
  0x24   : > { %305 = vst [vmem:[%s591_s6 + $0x60] sm:$0xff] %v289_v61  ;;  %306 = vst [vmem:[%s591_s6 + $0x68] sm:$0xff] %v290_v62  ;;  %v292_v0 = vmax.f32 %v276_v63, 0.0 }
  0x25   : > { %307 = vst [vmem:[%s591_s6 + $0x70] sm:$0xff] %v291_v2 }
  0x26   : > { %308 = vst [vmem:[%s591_s6 + $0x78] sm:$0xff] %v292_v0 }
  0x27 PF: > { %s13_s16 = sadd.s32 1, %s503_s16   ;;  %s658_s12 = smov %s495_s14 }
  0x28   : > { %p10_p7 = scmp.ge.s32.totalorder %s13_s16, 6   ;;  %s659_s13 = smov %s499_s15 }
  0x29   : > { %s660_s14 = smov %s663_s17  ;;  %s661_s15 = smov %s667_s18 }
  0x2a   :  { %12 = sbr.rel (!%p10_p7) target bundleno = 3 (0x3), region = 62 }

// kernel: block_forward.2
= control target key start
LH: loop header
LB: loop body
LE: loop exit
PB: predicated region body
PF: predicated region fallthrough
CT: control target
= control target key end

     0   :  { %s3656_s12 = smov 0   ;;  %s3658_s13 = smov 0   ;;  %s4606_s0 = inlined_call_operand.vmem [shape: bf16[2,18,18,4], index: 0, kind: input, shape index: {}]   ;;  %s4607_s1 = inlined_call_operand.vmem [shape: bf16[9,4,128], index: 1, kind: input, shape index: {}]   ;;  %s4608_s2 = inlined_call_operand.vmem [shape: f32[2,16,16,128], index: 2, kind: output, shape index: {0}]   ;;  %s4609_s3 = inlined_call_operand.vmem [shape: f32[2,128], index: 3, kind: output, shape index: {1}]  }
   0x1   :  { %s3660_s14 = smov 0   ;;  %s3662_s15 = smov 0  }
   0x2   :  { %s3664_s16 = smov 0  }
   0x3 LB: > { %s23_s17 = sadd.s32 1, %s3625_s14  ;;  %s26_s18 = sadd.s32 1, %s3629_s15  ;;  %s3633_s16 = sphi %s3664_s16, %s14_s16   ;;  %s3629_s15 = sphi %s3662_s15, %s4631_s15   ;;  %s3625_s14 = sphi %s3660_s14, %s4630_s14   ;;  %s3621_s13 = sphi %s3658_s13, %s4629_s13   ;;  %s3617_s12 = sphi %s3656_s12, %s4628_s12  }
   0x4   : > { %p24_p0 = scmp.ge.s32.totalorder %s23_s17, 2  ;;  %p2857_p1 = scmp.ge.s32.totalorder %s3633_s16, 1 }
   0x5   : > { %p149_p2 = scmp.lt.s32.totalorder %s3633_s16, 5 }
   0x6   : > { %s4633_s17 = smov (%p24_p0, %s23_s17), 0  ;;  %s4635_s18 = smov (!%p24_p0, %s26_s18), %s3629_s15 }
   0x7   : > { %p150_p3 = pnand %p2857_p1, %p149_p2  ;;  %p28_p4 = scmp.ge.s32.totalorder %s4635_s18, 2 }
   0x9   : > { %s4637_s18 = smov (%p28_p4, %s4635_s18), 0  ;;  %153 = sbr.rel (%p150_p3) target bundleno = 451 (0x1c3), region = 28 }
  0x10   : > { %p178_p5 = scmp.lt.s32.totalorder %s3621_s13, 1  ;;  %s2859_s19 = sshll.u32 %s3617_s12, 3 }
  0x11   : > { %p186_p6 = scmp.lt.s32.totalorder %s2859_s19, 15  ;;  %p195_p7 = scmp.eq.s32.totalorder %s3621_s13, 0 }
  0x12   : > { %s4639_s13 = smov (!%p178_p5, %s3621_s13), 1  ;;  %p196_p8 = scmp.eq.s32.totalorder %s3617_s12, 0 }
  0x13   : > { %s4641_s19 = smov (!%p186_p6, %s2859_s19), 15  ;;  %s3528_s20 = smul.u32 216, %s4639_s13 }
  0x14   : > { %s2861_s21 = sshll.u32 %s4639_s13, 5  ;;  %s2860_s22 = sshll.u32 %s4641_s19, 1 }
  0x15   : > { %s182_s25 = scalar_lea.vmem %s4606_s0, %s3528_s20  ;;  %s190_s26 = sadd.s32 %s2861_s21, %s2860_s22 }
  0x16   : > { %s2862_s27 = sshll.u32 %s190_s26, 3  ;;  %p197_p9 = pnand %p196_p8, %p195_p7 }
  0x17   : > { %s3696_s30 = scalar_lea.vmem %s4608_s2, %s2862_s27  ;;  %v3635_v0 = vmov (!%p197_p9), 0.0  }
  0x18   : > { %200 = sbr.rel (%p197_p9) target bundleno = 31 (0x1f), region = 32  ;;  %201 = vst [vmem:[%s4609_s3] sm:$0x3] (!%p197_p9), %v3635_v0 }
  0x1f PF: > { %v2866_v1 = vld [vmem:[%s4607_s1 + $0x2] sm:$0x3]  ;;  %vm477_vm0 = vcmask 1041408   ;;  %v2983_v2 = vld [vmem:[%s4607_s1 + $0x8] sm:$0x3]  ;;  %s3144_s10 = smul.u32 96, %s3617_s12 }
  0x20   : > { %3518 = vmatprep.subr.msk.bf16.mxu1 %vm477_vm0, %v2866_v1  ;;  %3522 = vmatprep.subr.msk.bf16.mxu0 %vm477_vm0, %v2983_v2  ;;  %v479_v3 = vsel %vm477_vm0, %v2866_v1, 0  ;;  %v3712_v4 = vsel %vm477_vm0, %v2983_v2, 0  ;;  %vm231_vm1 = vsmask.f32 3328  ;;  %vm232_vm2 = vsmask.f32 7440 }
  0x21   : > { %3227 = vmatpush3.bf16.msra.mxu1 %v479_v3  ;;  %3299 = vmatpush3.bf16.msra.mxu0 %v3712_v4  ;;  %s3715_s11 = scalar_lea.vmem %s182_s25, %s3144_s10  ;;  %v3720_v5 = vld [vmem:[%s4607_s1] sm:$0x3]  ;;  %v3725_v6 = vld [vmem:[%s4607_s1 + $0xa] sm:$0x3]  ;;  %vm3760_vm3 = vmor %vm231_vm1, %vm232_vm2  ;;  %vm452_vm4 = vcmask 31744   ;;  %vm766_vm5 = vcmask 1042432  }
  0x22   : > { %v3728_v7 = vld [vmem:[%s3715_s11] sm:$0xf]  ;;  %v3731_v8 = vld [vmem:[%s3715_s11 + $0x4] sm:$0xf]  ;;  %v3734_v9 = vld [vmem:[%s3715_s11 + $0x8] sm:$0x1]  ;;  %3519 = vmatprep.subr.msk.bf16.mxu1 %vm477_vm0, %v3720_v5  ;;  %3524 = vmatprep.subr.msk.bf16.mxu0 %vm477_vm0, %v3725_v6 }
  0x23   : > { %v235_v10 = vshrl.u32 %v3728_v7, 16  ;;  %v238_v11 = vshll.u32 %v3728_v7, 16  ;;  %v244_v12 = vshll.u32 %v3731_v8, 16  ;;  %v248_v13 = vshrl.u32 %v3731_v8, 16  ;;  %v2959_v14 = vld [vmem:[%s3715_s11 + $0xc] sm:$0xf] }
  0x24   : > { %v254_v15 = vshll.u32 %v3734_v9, 16  ;;  %v3747_v16 = vld [vmem:[%s3715_s11 + $0x10] sm:$0xf]  ;;  %v3750_v17 = vld [vmem:[%s3715_s11 + $0x14] sm:$0x1]  ;;  %v1218_v23 = vshrl.u32 %v2959_v14, 16 }
  0x25   : > { %v237_v18 = vrot.slane %v235_v10, 4  ;;  %v240_v19 = vrot.slane %v238_v11, 5  ;;  %v246_v20 = vrot.slane %v244_v12, 5  ;;  %v250_v21 = vrot.slane %v248_v13, 4  ;;  %v3756_v30 = vld [vmem:[%s3715_s11 + $0xc] sm:$0xf] }
  0x26   : > { %v256_v22 = vrot.slane %v254_v15, 5  ;;  %v1221_v24 = vshll.u32 %v2959_v14, 16  ;;  %v1227_v25 = vshll.u32 %v3747_v16, 16  ;;  %v1231_v28 = vshrl.u32 %v3747_v16, 16  ;;  %v3765_v35 = vld [vmem:[%s3715_s11 + $0x10] sm:$0xf] }
  0x27   : > { %v241_v26 = vor.u32 %v240_v19, %v237_v18  ;;  %v251_v27 = vor.u32 %v250_v21, %v246_v20  ;;  %v1237_v29 = vshll.u32 %v3750_v17, 16  ;;  %v1220_v32 = vrot.slane %v1218_v23, 4  ;;  %v3768_v41 = vld [vmem:[%s3715_s11 + $0x14] sm:$0x1]  ;;  %v2962_v56 = vld [vmem:[%s3715_s11 + $0x18] sm:$0xf] }
  0x28   : > { %v1223_v33 = vrot.slane %v1221_v24, 5  ;;  %v1229_v34 = vrot.slane %v1227_v25, 5  ;;  %v1233_v38 = vrot.slane %v1231_v28, 4  ;;  %v259_v42 = vshrl.u32 %v3756_v30, 16  ;;  %v3786_v61 = vld [vmem:[%s3715_s11 + $0x1c] sm:$0xf] }
  0x29   : > { %v242_v36 = vrot.slane %v241_v26, 4  ;;  %v252_v37 = vrot.slane %v251_v27, 4  ;;  %v1239_v40 = vrot.slane %v1237_v29, 5  ;;  %v262_v43 = vshll.u32 %v3756_v30, 16  ;;  %v3789_v62 = vld [vmem:[%s3715_s11 + $0x20] sm:$0x1] }
  0x2a   : > { %v1224_v39 = vor.u32 %v1223_v33, %v1220_v32  ;;  %v1234_v46 = vor.u32 %v1233_v38, %v1229_v34  ;;  %v268_v47 = vshll.u32 %v3765_v35, 16  ;;  %v261_v50 = vrot.slane %v259_v42, 4  ;;  %v3806_v27 = vld [vmem:[%s3715_s11 + $0x1c] sm:$0xf] }
  0x2b   : > { %v247_v44 = vsel %vm3760_vm3, %v242_v36, %v246_v20  ;;  %v257_v45 = vsel %vm3760_vm3, %v252_v37, %v256_v22  ;;  %v264_v51 = vrot.slane %v262_v43, 5  ;;  %v272_v54 = vshrl.u32 %v3765_v35, 16  ;;  %v3803_v22 = vld [vmem:[%s3715_s11 + $0x18] sm:$0xf] }
  0x2c   : > { %v2867_v48 = vcombine.low %v247_v44, %v257_v45  ;;  %v1225_v49 = vrot.slane %v1224_v39, 4  ;;  %v1235_v52 = vrot.slane %v1234_v46, 4  ;;  %v270_v53 = vrot.slane %v268_v47, 5 }
  0x2d   : > { %v278_v55 = vshll.u32 %v3768_v41, 16  ;;  %v1609_v58 = vrot.slane %v3747_v16, 5  ;;  %v1612_v59 = vrot.slane %v3750_v17, 5  ;;  %v265_v60 = vor.u32 %v264_v51, %v261_v50 }
  0x2e   : > { %3228 = vmatprep.mubr.msk.bf16.mxu1 %vm452_vm4, %v2867_v48  ;;  %v1230_v57 = vsel %vm3760_vm3, %v1225_v49, %v1229_v34  ;;  %v1240_v63 = vsel %vm3760_vm3, %v1235_v52, %v1239_v40  ;;  %v274_v0 = vrot.slane %v272_v54, 4  ;;  %v643_v2 = vsel %vm477_vm0, %v3720_v5, 0  ;;  %v3816_v34 = vld [vmem:[%s3715_s11 + $0x20] sm:$0x1]  ;;  %v2965_v40 = vld [vmem:[%s3715_s11 + $0x24] sm:$0xf] }
  0x2f   : > { %v280_v1 = vrot.slane %v278_v55, 5  ;;  %v2984_v3 = vcombine.low %v1230_v57, %v1240_v63  ;;  %v266_v10 = vrot.slane %v265_v60, 4  ;;  %v1242_v11 = vshrl.u32 %v2962_v56, 16  ;;  %v3827_v49 = vld [vmem:[%s3715_s11 + $0x28] sm:$0xf] }
  0x30   : > { %v1245_v12 = vshll.u32 %v2962_v56, 16  ;;  %v275_v13 = vor.u32 %v274_v0, %v270_v53  ;;  %v1251_v14 = vshll.u32 %v3786_v61, 16  ;;  %v1255_v15 = vshrl.u32 %v3786_v61, 16  ;;  %v3838_v63 = vld [vmem:[%s3715_s11 + $0x24] sm:$0xf] }
  0x31   : > { %v1261_v18 = vshll.u32 %v3789_v62, 16  ;;  %3300 = vmatprep.mubr.msk.bf16.mxu0 %vm452_vm4, %v2984_v3  ;;  %v271_v19 = vsel %vm3760_vm3, %v266_v10, %v270_v53  ;;  %v1244_v20 = vrot.slane %v1242_v11, 4  ;;  %v1616_v21 = vrot.slane %v3786_v61, 5  ;;  %v3833_v53 = vld [vmem:[%s3715_s11 + $0x2c] sm:$0x1] }
  0x32   : > { %v1247_v5 = vrot.slane %v1245_v12, 5  ;;  %v276_v23 = vrot.slane %v275_v13, 4  ;;  %v1253_v24 = vrot.slane %v1251_v14, 5  ;;  %v1257_v25 = vrot.slane %v1255_v15, 4  ;;  %v3842_v11 = vld [vmem:[%s3715_s11 + $0x28] sm:$0xf] }
  0x33   : > { %v1263_v26 = vrot.slane %v1261_v18, 5  ;;  %v3810_v29 = vrot.slane %v1616_v21, 4  ;;  %v1619_v32 = vrot.slane %v3789_v62, 5  ;;  %v1714_v33 = vsel %vm477_vm0, %v3725_v6, 0  ;;  %v3849_v15 = vld [vmem:[%s4607_s1 + $0xc] sm:$0x3] }
  0x34   : > { %v1248_v28 = vor.u32 %v1247_v5, %v1244_v20  ;;  %v281_v36 = vsel %vm3760_vm3, %v276_v23, %v280_v1  ;;  %v1258_v37 = vor.u32 %v1257_v25, %v1253_v24  ;;  %v283_v38 = vshrl.u32 %v3803_v22, 16 }
  0x35   : > { %v286_v39 = vshll.u32 %v3803_v22, 16  ;;  %v2868_v42 = vcombine.low %v271_v19, %v281_v36  ;;  %v292_v44 = vshll.u32 %v3806_v27, 16  ;;  %v296_v45 = vshrl.u32 %v3806_v27, 16  ;;  %v2968_v36 = vld [vmem:[%s3715_s11 + $0x30] sm:$0xf] }
  0x36   : > { %v1249_v43 = vrot.slane %v1248_v28, 4  ;;  %v1259_v46 = vrot.slane %v1258_v37, 4  ;;  %v285_v6 = vrot.slane %v283_v38, 4  ;;  %v302_v48 = vshll.u32 %v3816_v34, 16  ;;  %v3857_v28 = vld [vmem:[%s3715_s11 + $0x2c] sm:$0x1] }
  0x37   : > { %v288_v47 = vrot.slane %v286_v39, 5  ;;  %3229 = vmatmul.mubr.msk.bf16.vlgmr.msra.gmra.mrb[0].mxu1 %vm452_vm4, %v2868_v42  ;;  %v294_v51 = vrot.slane %v292_v44, 5  ;;  %v298_v52 = vrot.slane %v296_v45, 4  ;;  %v1266_v54 = vshrl.u32 %v2965_v40, 16  ;;  %v3867_v45 = vld [vmem:[%s3715_s11 + $0x34] sm:$0xf] }
  0x38   : > { %v1254_v50 = vsel %vm3760_vm3, %v1249_v43, %v1253_v24  ;;  %3245 = vmatpush3.bf16.msra.mxu1 %v643_v2  ;;  %v1264_v55 = vsel %vm3760_vm3, %v1259_v46, %v1263_v26  ;;  %v304_v57 = vrot.slane %v302_v48, 5  ;;  %v1269_v60 = vshll.u32 %v2965_v40, 16 }
  0x39   : > { %v289_v56 = vor.u32 %v288_v47, %v285_v6  ;;  %v2985_v0 = vcombine.low %v1254_v50, %v1264_v55  ;;  %v299_v1 = vor.u32 %v298_v52, %v294_v51  ;;  %v1268_v3 = vrot.slane %v1266_v54, 4  ;;  %v3873_v50 = vld [vmem:[%s4607_s1 + $0x4] sm:$0x3]  ;;  %v3879_v55 = vld [vmem:[%s3715_s11 + $0x38] sm:$0x1] }
  0x3a   : > { %v1275_v10 = vshll.u32 %v3827_v49, 16  ;;  %v1271_v13 = vrot.slane %v1269_v60, 5  ;;  %v1279_v2 = vshrl.u32 %v3827_v49, 16  ;;  %v1285_v14 = vshll.u32 %v3833_v53, 16  ;;  %3520 = vmatprep.subr.msk.bf16.mxu1 %vm477_vm0, %v3873_v50 }
  0x3b   : > { %v290_v12 = vrot.slane %v289_v56, 4  ;;  %3301 = vmatmul.mubr.msk.bf16.vlgmr.msra.gmra.mrb[0].mxu0 %vm452_vm4, %v2985_v0  ;;  %v300_v18 = vrot.slane %v299_v1, 4  ;;  %v307_v20 = vshrl.u32 %v3838_v63, 16  ;;  %v310_v5 = vshll.u32 %v3838_v63, 16 }
  0x3c   : > { %v1277_v19 = vrot.slane %v1275_v10, 5  ;;  %3317 = vmatpush3.bf16.msra.mxu0 %v1714_v33  ;;  %v1272_v24 = vor.u32 %v1271_v13, %v1268_v3  ;;  %v1281_v25 = vrot.slane %v1279_v2, 4  ;;  %v1287_v26 = vrot.slane %v1285_v14, 5  ;;  %v3885_v3 = vld [vmem:[%s3715_s11 + $0x30] sm:$0xf] }
  0x3d   : > { %v295_v23 = vsel %vm3760_vm3, %v290_v12, %v294_v51  ;;  %v305_v37 = vsel %vm3760_vm3, %v300_v18, %v304_v57  ;;  %v309_v38 = vrot.slane %v307_v20, 4  ;;  %v312_v39 = vrot.slane %v310_v5, 5  ;;  %3525 = vmatprep.subr.msk.bf16.mxu0 %vm477_vm0, %v3849_v15  ;;  %v3891_v14 = vld [vmem:[%s3715_s11 + $0x34] sm:$0xf] }
  0x3e   : > { %v316_v40 = vshll.u32 %v3842_v11, 16  ;;  %v2869_v33 = vcombine.low %v295_v23, %v305_v37  ;;  %v1273_v42 = vrot.slane %v1272_v24, 4  ;;  %v1282_v43 = vor.u32 %v1281_v25, %v1277_v19  ;;  %v3899_v37 = vld [vmem:[%s3715_s11 + $0x38] sm:$0x1] }
  0x3f   : > { %v320_v44 = vshrl.u32 %v3842_v11, 16  ;;  %v313_v46 = vor.u32 %v312_v39, %v309_v38  ;;  %v326_v47 = vshll.u32 %v3857_v28, 16  ;;  %v1290_v48 = vshrl.u32 %v2968_v36, 16 }
  0x40   : > { %v318_v6 = vrot.slane %v316_v40, 5  ;;  %3232 = vmatprep.mubr.msk.bf16.mxu1 %vm452_vm4, %v2869_v33  ;;  %v1278_v51 = vsel %vm3760_vm3, %v1273_v42, %v1277_v19  ;;  %v1283_v52 = vrot.slane %v1282_v43, 4  ;;  %v1293_v56 = vshll.u32 %v2968_v36, 16 }
  0x41   : > { %v322_v54 = vrot.slane %v320_v44, 4  ;;  %v314_v57 = vrot.slane %v313_v46, 4  ;;  %v328_v60 = vrot.slane %v326_v47, 5  ;;  %v1292_v0 = vrot.slane %v1290_v48, 4  ;;  %v3000_v46 = vld [vmem:[%s3715_s11 + $0xc] sm:$0xe] }
  0x42   : > { %v1299_v1 = vshll.u32 %v3867_v45, 16  ;;  %v1288_v10 = vsel %vm3760_vm3, %v1283_v52, %v1287_v26  ;;  %v1295_v13 = vrot.slane %v1293_v56, 5  ;;  %v1303_v2 = vshrl.u32 %v3867_v45, 16  ;;  %v3908_v52 = vld [vmem:[%s3715_s11 + $0x3c] sm:$0xf] }
  0x43   : > { %v323_v12 = vor.u32 %v322_v54, %v318_v6  ;;  %v2986_v18 = vcombine.low %v1278_v51, %v1288_v10  ;;  %v319_v19 = vsel %vm3760_vm3, %v314_v57, %v318_v6  ;;  %v1309_v5 = vshll.u32 %v3879_v55, 16 }
  0x44   : > { %v1301_v20 = vrot.slane %v1299_v1, 5  ;;  %v1296_v24 = vor.u32 %v1295_v13, %v1292_v0  ;;  %v1305_v25 = vrot.slane %v1303_v2, 4  ;;  %v331_v36 = vshrl.u32 %v3885_v3, 16  ;;  %v3925_v2 = vld [vmem:[%s3715_s11 + $0x44] sm:$0x1] }
  0x45   : > { %v324_v23 = vrot.slane %v323_v12, 4  ;;  %3304 = vmatprep.mubr.msk.bf16.mxu0 %vm452_vm4, %v2986_v18  ;;  %v1311_v26 = vrot.slane %v1309_v5, 5  ;;  %v334_v38 = vshll.u32 %v3885_v3, 16  ;;  %v340_v39 = vshll.u32 %v3891_v14, 16 }
  0x46   : > { %v344_v40 = vshrl.u32 %v3891_v14, 16  ;;  %v1297_v42 = vrot.slane %v1296_v24, 4  ;;  %v1306_v43 = vor.u32 %v1305_v25, %v1301_v20  ;;  %v333_v44 = vrot.slane %v331_v36, 4 }
  0x47   : > { %v329_v33 = vsel %vm3760_vm3, %v324_v23, %v328_v60  ;;  %v336_v47 = vrot.slane %v334_v38, 5  ;;  %v342_v48 = vrot.slane %v340_v39, 5  ;;  %v350_v57 = vshll.u32 %v3899_v37, 16  ;;  %v3914_v60 = vld [vmem:[%s3715_s11 + $0x40] sm:$0xf] }
  0x48   : > { %v2870_v6 = vcombine.low %v319_v19, %v329_v33  ;;  %v346_v51 = vrot.slane %v344_v40, 4  ;;  %v1302_v54 = vsel %vm3760_vm3, %v1297_v42, %v1301_v20  ;;  %v1307_v56 = vrot.slane %v1306_v43, 4  ;;  %v3001_v23 = vld [vmem:[%s3715_s11 + $0x18] sm:$0xe]  ;;  %v3937_v39 = vld [vmem:[%s3715_s11 + $0x48] sm:$0xf] }
  0x49   : > { %vm767_vm6 = vcmask 1046532   ;;  %v337_v0 = vor.u32 %v336_v47, %v333_v44  ;;  %v3008_v12 = vrot.slane %v3000_v46, 9  ;;  %v1611_v13 = vrot.slane %v1609_v58, 4  ;;  %v3945_v43 = vld [vmem:[%s3715_s11 + $0x4c] sm:$0xf] }
  0x4a   : > { %3233 = vmatmul.mubr.msk.bf16.gmra.mrb[4].mxu1 %vm452_vm4, %v2870_v6  ;;  %v347_v1 = vor.u32 %v346_v51, %v342_v48  ;;  %vm3918_vm7 = vmor %vm766_vm5, %vm767_vm6  ;;  %v1312_v18 = vsel %vm3760_vm3, %v1307_v56, %v1311_v26  ;;  %v352_v19 = vrot.slane %v350_v57, 5  ;;  %v355_v20 = vshrl.u32 %v3908_v52, 16  ;;  %v3955_v51 = vld [vmem:[%s3715_s11 + $0x50] sm:$0x1] }
  0x4b   : > { %v358_v5 = vshll.u32 %v3908_v52, 16  ;;  %v2987_v24 = vcombine.low %v1302_v54, %v1312_v18  ;;  %v338_v25 = vrot.slane %v337_v0, 4  ;;  %v1610_v38 = vsel %vm3918_vm7, %v3008_v12, %v1609_v58  ;;  %v3002_v0 = vld [vmem:[%s3715_s11 + $0x24] sm:$0xe] }
  0x4c   : > { %v348_v36 = vrot.slane %v347_v1, 4  ;;  %v1613_v26 = vsel %vm3918_vm7, %v1611_v13, %v1612_v59  ;;  %v357_v40 = vrot.slane %v355_v20, 4  ;;  %v364_v42 = vshll.u32 %v3914_v60, 16 }
  0x4d   : > { %v360_v33 = vrot.slane %v358_v5, 5  ;;  %3305 = vmatmul.mubr.msk.bf16.gmra.mrb[4].mxu0 %vm452_vm4, %v2987_v24  ;;  %v343_v16 = vsel %vm3760_vm3, %v338_v25, %v342_v48  ;;  %v3017_v44 = vcombine.low %v1610_v38, %v1613_v26  ;;  %v368_v17 = vshrl.u32 %v3914_v60, 16  ;;  %v3981_v25 = vld [vmem:[%s3715_s11 + $0x58] sm:$0xf]  ;;  %v3987_v26 = vld [vmem:[%s4607_s1 + $0xe] sm:$0x3] }
  0x4e   : > { %v353_v58 = vsel %vm3760_vm3, %v348_v36, %v352_v19  ;;  %v366_v6 = vrot.slane %v364_v42, 5  ;;  %v374_v47 = vshll.u32 %v3925_v2, 16  ;;  %v3009_v56 = vrot.slane %v3001_v23, 9 }
  0x4f   : > { %v2871_v46 = vcombine.low %v343_v16, %v353_v58  ;;  %v361_v59 = vor.u32 %v360_v33, %v357_v40  ;;  %3318 = vmatprep.mubr.msk.bf16.mxu0 %vm452_vm4, %v3017_v44  ;;  %v370_v54 = vrot.slane %v368_v17, 4  ;;  %v1620_v48 = vsel %vm3918_vm7, %v3810_v29, %v1619_v32 }
  0x50   : > { %v1916_v57 = vsel %vm477_vm0, %v3849_v15, 0  ;;  %v376_v12 = vrot.slane %v374_v47, 5  ;;  %v379_v13 = vshrl.u32 %v3937_v39, 16  ;;  %v382_v18 = vshll.u32 %v3937_v39, 16  ;;  %v3976_v15 = vld [vmem:[%s3715_s11 + $0x54] sm:$0xf] }
  0x51   : > { %3236 = vmatprep.mubr.msk.bf16.mxu1 %vm452_vm4, %v2871_v46  ;;  %v362_v1 = vrot.slane %v361_v59, 4  ;;  %v371_v19 = vor.u32 %v370_v54, %v366_v6  ;;  %v1617_v62 = vsel %vm3918_vm7, %v3009_v56, %v1616_v21  ;;  %v388_v29 = vshll.u32 %v3945_v43, 16  ;;  %v3995_v46 = vld [vmem:[%s3715_s11 + $0x5c] sm:$0x1] }
  0x52   : > { %v392_v32 = vshrl.u32 %v3945_v43, 16  ;;  %v3018_v5 = vcombine.low %v1617_v62, %v1620_v48  ;;  %v381_v23 = vrot.slane %v379_v13, 4  ;;  %v384_v24 = vrot.slane %v382_v18, 5 }
  0x53   : > { %v367_v20 = vsel %vm3760_vm3, %v362_v1, %v366_v6  ;;  %v372_v36 = vrot.slane %v371_v19, 4  ;;  %v390_v61 = vrot.slane %v388_v29, 5  ;;  %v398_v21 = vshll.u32 %v3955_v51, 16  ;;  %v3003_v1 = vld [vmem:[%s3715_s11 + $0x30] sm:$0xe] }
  0x54   : > { %v394_v38 = vrot.slane %v392_v32, 4  ;;  %v385_v40 = vor.u32 %v384_v24, %v381_v23  ;;  %v3010_v33 = vrot.slane %v3002_v0, 9  ;;  %v1623_v42 = vrot.slane %v3827_v49, 5  ;;  %v3004_v19 = vld [vmem:[%s3715_s11 + $0x3c] sm:$0xe] }
  0x55   : > { %v1626_v16 = vrot.slane %v3833_v53, 5  ;;  %v377_v58 = vsel %vm3760_vm3, %v372_v36, %v376_v12  ;;  %3319 = vmatmul.mubr.msk.bf16.vlgmr.msra.gmra.mrb[0].mxu0 %vm452_vm4, %v3018_v5  ;;  %v400_v17 = vrot.slane %v398_v21, 5  ;;  %v403_v59 = vshrl.u32 %v3976_v15, 16  ;;  %v4016_v5 = vld [vmem:[%s3715_s11 + $0x40] sm:$0xf] }
  0x56   : > { %v395_v44 = vor.u32 %v394_v38, %v390_v61  ;;  %v2872_v6 = vcombine.low %v367_v20, %v377_v58  ;;  %3335 = vmatpush3.bf16.msra.mxu0 %v1916_v57  ;;  %v386_v47 = vrot.slane %v385_v40, 4  ;;  %v1624_v49 = vsel %vm3918_vm7, %v3010_v33, %v1623_v42  ;;  %v4019_v23 = vld [vmem:[%s3715_s11 + $0x44] sm:$0x1] }
  0x57   : > { %v1625_v53 = vrot.slane %v1623_v42, 4  ;;  %v405_v56 = vrot.slane %v403_v59, 4  ;;  %v406_v48 = vshll.u32 %v3976_v15, 16  ;;  %v412_v0 = vshll.u32 %v3981_v25, 16  ;;  %3526 = vmatprep.subr.msk.bf16.mxu0 %vm477_vm0, %v3987_v26 }
  0x58   : > { %v396_v54 = vrot.slane %v395_v44, 4  ;;  %3237 = vmatmul.mubr.msk.bf16.gmra.mrb[8].mxu1 %vm452_vm4, %v2872_v6  ;;  %v391_v57 = vsel %vm3760_vm3, %v386_v47, %v390_v61  ;;  %v416_v13 = vshrl.u32 %v3981_v25, 16  ;;  %v422_v18 = vshll.u32 %v3995_v46, 16 }
  0x59   : > { %v1627_v12 = vsel %vm3918_vm7, %v1625_v53, %v1626_v16  ;;  %v408_v32 = vrot.slane %v406_v48, 5  ;;  %v414_v20 = vrot.slane %v412_v0, 5  ;;  %v3011_v61 = vrot.slane %v3003_v1, 9  ;;  %v3005_v48 = vld [vmem:[%s3715_s11 + $0x48] sm:$0xe] }
  0x5a   : > { %v401_v62 = vsel %vm3760_vm3, %v396_v54, %v400_v17  ;;  %v3019_v29 = vcombine.low %v1624_v49, %v1627_v12  ;;  %v418_v36 = vrot.slane %v416_v13, 4  ;;  %v1630_v21 = vrot.slane %v3867_v45, 5  ;;  %v4036_v54 = vld [vmem:[%s3715_s11 + $0x4c] sm:$0xf]  ;;  %v4049_v13 = vld [vmem:[%s3715_s11 + $0x58] sm:$0xf] }
  0x5b   : > { %v2873_v24 = vcombine.low %v391_v57, %v401_v62  ;;  %v409_v38 = vor.u32 %v408_v32, %v405_v56  ;;  %v1633_v40 = vrot.slane %v3879_v55, 5  ;;  %v3012_v33 = vrot.slane %v3004_v19, 9  ;;  %v4039_v56 = vld [vmem:[%s3715_s11 + $0x50] sm:$0x1]  ;;  %v3006_v19 = vld [vmem:[%s3715_s11 + $0x54] sm:$0xe] }
  0x5c   : > { %3322 = vmatprep.mubr.msk.bf16.mxu0 %vm452_vm4, %v3019_v29  ;;  %v419_v42 = vor.u32 %v418_v36, %v414_v20  ;;  %v424_v16 = vrot.slane %v422_v18, 5  ;;  %v1637_v58 = vrot.slane %v4016_v5, 5  ;;  %v1640_v44 = vrot.slane %v4019_v23, 5  ;;  %v4052_v18 = vld [vmem:[%s3715_s11 + $0x5c] sm:$0x1] }
  0x5d   : > { %3240 = vmatprep.mubr.msk.bf16.mxu1 %vm452_vm4, %v2873_v24  ;;  %v410_v17 = vrot.slane %v409_v38, 4  ;;  %v1631_v45 = vsel %vm3918_vm7, %v3011_v61, %v1630_v21  ;;  %v1632_v59 = vrot.slane %v1630_v21, 4  ;;  %v2883_v57 = vcombine.low %v3728_v7, %v3731_v8  ;;  %4616 = vst [vmem:[#allocation2_spill] sm:$0xff] %v4052_v18  ;;  %v4056_v32 = vld [vmem:[%s3715_s11 + $0x64] sm:$0xf] }
  0x5e   : > { %v420_v55 = vrot.slane %v419_v42, 4  ;;  %v1638_v6 = vsel %vm3918_vm7, %v3012_v33, %v1637_v58  ;;  %v1639_v47 = vrot.slane %v1637_v58, 4  ;;  %v3013_v24 = vrot.slane %v3005_v48, 9  ;;  %v4070_v42 = vld [vmem:[%s3715_s11 + $0x68] sm:$0x1] }
  0x5f   : > { %v415_v49 = vsel %vm3760_vm3, %v410_v17, %v414_v20  ;;  %v1634_v53 = vsel %vm3918_vm7, %v1632_v59, %v1633_v40  ;;  %v3007_v20 = vld [vmem:[%s3715_s11 + $0x60] sm:$0xe]  ;;  %v1644_v7 = vrot.slane %v4036_v54, 5  ;;  %v1647_v36 = vrot.slane %v4039_v56, 5  ;;  %4617 = vst [vmem:[#allocation3_spill] sm:$0xff] %v4070_v42 }
  0x60   : > { %v425_v0 = vsel %vm3760_vm3, %v420_v55, %v424_v16  ;;  %v3020_v1 = vcombine.low %v1631_v45, %v1634_v53  ;;  %v1641_v12 = vsel %vm3918_vm7, %v1639_v47, %v1640_v44  ;;  %v3014_v61 = vrot.slane %v3006_v19, 9  ;;  %v743_v17 = vld [vmem:[%s3715_s11 + $0xc] sm:$0xe]  ;;  %v745_v19 = vld [vmem:[%s3715_s11 + $0x24] sm:$0xe] }
  0x61   : > { %v2874_v62 = vcombine.low %v415_v49, %v425_v0  ;;  %v3021_v29 = vcombine.low %v1638_v6, %v1641_v12  ;;  %v1651_v38 = vrot.slane %v4049_v13, 5  ;;  %v1654_v21 = vrot.slane %v4052_v18, 5  ;;  %v744_v0 = vld [vmem:[%s3715_s11 + $0x18] sm:$0xe] }
  0x62   : > { %3323 = vmatmul.mubr.msk.bf16.gmra.mrb[4].mxu0 %vm452_vm4, %v3020_v1  ;;  %v1645_v40 = vsel %vm3918_vm7, %v3013_v24, %v1644_v7  ;;  %v1646_v33 = vrot.slane %v1644_v7, 4  ;;  %v1658_v44 = vrot.slane %v4056_v32, 5  ;;  %v778_v45 = vrot.slane %v3765_v35, 5  ;;  %v746_v7 = vld [vmem:[%s3715_s11 + $0x30] sm:$0xe] }
  0x63   : > { %3241 = vmatmul.mubr.msk.bf16.gmra.mrb[12].mxu1 %vm452_vm4, %v2874_v62  ;;  %3326 = vmatprep.mubr.msk.bf16.mxu0 %vm452_vm4, %v3021_v29  ;;  %v1652_v16 = vsel %vm3918_vm7, %v3014_v61, %v1651_v38  ;;  %v1653_v58 = vrot.slane %v1651_v38, 4  ;;  %v2884_v59 = vcombine.low %v3756_v30, %v3765_v35  ;;  %v3015_v6 = vrot.slane %v3007_v20, 9  ;;  %v4095_v62 = vld [vmem:[%s4607_s1 + $0x6] sm:$0x3] }
  0x64   : > { %3246 = vmatprep.mubr.msk.bf16.mxu1 %vm452_vm4, %v2883_v57  ;;  %v1648_v55 = vsel %vm3918_vm7, %v1646_v33, %v1647_v36  ;;  %v1660_v53 = vrot.slane %v1658_v44, 4  ;;  %v1661_v48 = vrot.slane %v4070_v42, 5  ;;  %v781_v1 = vrot.slane %v3768_v41, 5  ;;  %v4369_v42 = vld [vmem:[%s3715_s11 + $0x70] sm:$0xf] }
  0x65   : > { %v3022_v47 = vcombine.low %v1645_v40, %v1648_v55  ;;  %v1655_v49 = vsel %vm3918_vm7, %v1653_v58, %v1654_v21  ;;  %v2885_v57 = vcombine.low %v3803_v22, %v3806_v27  ;;  %v876_v30 = vsel %vm477_vm0, %v3873_v50, 0 }
  0x66   : > { %v3023_v12 = vcombine.low %v1652_v16, %v1655_v49  ;;  %v2900_v35 = vrot.slane %v743_v17, 9  ;;  %v780_v29 = vrot.slane %v778_v45, 4  ;;  %v2901_v20 = vrot.slane %v744_v0, 9 }
  0x67   : > { %v1659_v41 = vsel %vm3918_vm7, %v3015_v6, %v1658_v44  ;;  %v1662_v22 = vsel %vm3918_vm7, %v1660_v53, %v1661_v48  ;;  %v785_v24 = vrot.slane %v3806_v27, 5  ;;  %v788_v61 = vrot.slane %v3816_v34, 5  ;;  %v747_v53 = vld [vmem:[%s3715_s11 + $0x3c] sm:$0xe] }
  0x68   : > { %v4105_v50 = vsel %vm3918_vm7, %v2900_v35, %v778_v45  ;;  %v4112_v36 = vsel %vm3918_vm7, %v780_v29, %v781_v1  ;;  %v2902_v38 = vrot.slane %v745_v19, 9  ;;  %v792_v21 = vrot.slane %v3842_v11, 5 }
  0x69   : > { %v2886_v40 = vcombine.low %v3838_v63, %v3842_v11  ;;  %v2909_v27 = vcombine.low %v4105_v50, %v4112_v36  ;;  %v4124_v33 = vsel %vm3918_vm7, %v2901_v20, %v785_v24  ;;  %v787_v16 = vrot.slane %v785_v24, 4  ;;  %v3575_v11 = vld [vmem:[%s3715_s11 + $0x18] sm:$0xff]   ;;  %v3585_v50 = vld [vmem:[%s3715_s11 + $0x6c] sm:$0xff]  }
  0x6a   : > { %3327 = vmatmul.mubr.msk.bf16.gmra.mrb[8].mxu0 %vm452_vm4, %v3022_v47  ;;  %v3024_v34 = vcombine.low %v1659_v41, %v1662_v22  ;;  %v4128_v58 = vsel %vm3918_vm7, %v2902_v38, %v792_v21  ;;  %v794_v44 = vrot.slane %v792_v21, 4  ;;  %v795_v63 = vrot.slane %v3857_v28, 5  ;;  %v742_v47 = vld [vmem:[%s3715_s11] sm:$0xe]  ;;  %v3577_v41 = vld [vmem:[%s3715_s11 + $0x24] sm:$0xff]  }
  0x6b   : > { %3247 = vmatmul.mubr.msk.bf16.vlgmr.msra.gmra.mrb[0].mxu1 %vm452_vm4, %v2884_v59  ;;  %3330 = vmatprep.mubr.msk.bf16.mxu0 %vm452_vm4, %v3023_v12  ;;  %v4134_v17 = vsel %vm3918_vm7, %v787_v16, %v788_v61  ;;  %v2903_v45 = vrot.slane %v746_v7, 9  ;;  %v799_v59 = vrot.slane %v3891_v14, 5  ;;  %v802_v55 = vrot.slane %v3899_v37, 5  ;;  %v3068_v22 = vld [vmem:[%s3715_s11 + $0x18] sm:$0xf] }
  0x6c   : > { %3263 = vmatpush3.bf16.msra.mxu1 %v876_v30  ;;  %3250 = vmatprep.mubr.msk.bf16.mxu1 %vm452_vm4, %v2885_v57  ;;  %v2887_v6 = vcombine.low %v3885_v3, %v3891_v14  ;;  %v2910_v49 = vcombine.low %v4124_v33, %v4134_v17  ;;  %v4145_v28 = vsel %vm3918_vm7, %v794_v44, %v795_v63  ;;  %v771_v48 = vrot.slane %v3731_v8, 5  ;;  %v4177_v24 = vld [vmem:[%s3715_s11 + $0x1c] sm:$0xf]  ;;  %v748_v61 = vld [vmem:[%s3715_s11 + $0x48] sm:$0xe] }
  0x6d   : > { %3521 = vmatprep.subr.msk.bf16.mxu1 %vm477_vm0, %v4095_v62  ;;  %v4153_v37 = vsel %vm3918_vm7, %v2903_v45, %v799_v59  ;;  %v801_v3 = vrot.slane %v799_v59, 4  ;;  %v2904_v14 = vrot.slane %v747_v53, 9  ;;  %v806_v1 = vrot.slane %v3914_v60, 5  ;;  %v4201_v44 = vld [vmem:[%s4607_s1 + $0x10] sm:$0x3] }
  0x6e   : > { %v774_v57 = vrot.slane %v3734_v9, 5  ;;  %v2899_v12 = vrot.slane %v742_v47, 9  ;;  %v773_v35 = vrot.slane %v771_v48, 4  ;;  %v809_v20 = vrot.slane %v3925_v2, 5  ;;  %v3071_v59 = vld [vmem:[%s3715_s11 + $0x24] sm:$0xf] }
  0x6f   : > { %v4160_v8 = vsel %vm3918_vm7, %v801_v3, %v802_v55  ;;  %v4169_v19 = vsel %vm3918_vm7, %v2904_v14, %v806_v1  ;;  %v808_v29 = vrot.slane %v806_v1, 4  ;;  %v2888_v9 = vcombine.low %v3908_v52, %v3914_v60  ;;  %v4210_v55 = vld [vmem:[%s3715_s11 + $0x28] sm:$0xf]  ;;  %v749_v3 = vld [vmem:[%s3715_s11 + $0x54] sm:$0xe]  ;;  %v3581_v14 = vld [vmem:[%s3715_s11 + $0x3c] sm:$0xff]  }
  0x70   : > { %v2298_v38 = vsel %vm477_vm0, %v3987_v26, 0  ;;  %v2889_v21 = vcombine.low %v3937_v39, %v3945_v43  ;;  %v772_v52 = vsel %vm3918_vm7, %v2899_v12, %v771_v48  ;;  %v775_v60 = vsel %vm3918_vm7, %v773_v35, %v774_v57  ;;  %v3074_v48 = vld [vmem:[%s3715_s11 + $0x30] sm:$0xf]  ;;  %v4317_v33 = vld [vmem:[%s3715_s11 + $0x58] sm:$0xf] }
  0x71   : > { %v4181_v7 = vsel %vm3918_vm7, %v808_v29, %v809_v20  ;;  %v2056_v16 = vshrl.u32 %v3068_v22, 16  ;;  %v2065_v26 = vshll.u32 %v4177_v24, 16  ;;  %v2069_v39 = vshrl.u32 %v4177_v24, 16  ;;  %v4230_v29 = vld [vmem:[%s3715_s11 + $0x34] sm:$0xf]  ;;  %v3582_v20 = vld [vmem:[%s3715_s11 + $0x48] sm:$0xff]  }
  0x72   : > { %3331 = vmatmul.mubr.msk.bf16.gmra.mrb[12].mxu0 %vm452_vm4, %v3024_v34  ;;  %v2059_v34 = vshll.u32 %v3068_v22, 16  ;;  %v2905_v63 = vrot.slane %v748_v61, 9  ;;  %v816_v45 = vrot.slane %v3955_v51, 5  ;;  %v2890_v47 = vcombine.low %v3976_v15, %v3981_v25  ;;  %v4234_v15 = vld [vmem:[%s3715_s11 + $0x20] sm:$0x1] }
  0x73   : > { %3251 = vmatmul.mubr.msk.bf16.gmra.mrb[4].mxu1 %vm452_vm4, %v2886_v40  ;;  %3336 = vmatprep.mubr.msk.bf16.mxu0 %vm452_vm4, %v3575_v11  ;;  %v3579_v40 = vld [vmem:[%s3715_s11 + $0x30] sm:$0xff]   ;;  %v813_v11 = vrot.slane %v3945_v43, 5  ;;  %v2908_v53 = vcombine.low %v772_v52, %v775_v60  ;;  %v2058_v51 = vrot.slane %v2056_v16, 4  ;;  %v4223_v57 = vrot.slane %v2065_v26, 5  ;;  %v4320_v17 = vld [vmem:[%s3715_s11 + $0x44] sm:$0x1] }
  0x74   : > { %3254 = vmatprep.mubr.msk.bf16.mxu1 %vm452_vm4, %v2887_v6  ;;  %v2061_v1 = vrot.slane %v2059_v34, 5  ;;  %v2071_v12 = vrot.slane %v2069_v39, 4  ;;  %v2083_v22 = vshll.u32 %v3071_v59, 16  ;;  %v2906_v52 = vrot.slane %v749_v3, 9 }
  0x75   : > { %v4214_v6 = vsel %vm3918_vm7, %v2905_v63, %v813_v11  ;;  %v815_v43 = vrot.slane %v813_v11, 4  ;;  %v2113_v60 = vshll.u32 %v4230_v29, 16  ;;  %v2117_v16 = vshrl.u32 %v4230_v29, 16 }
  0x76   : > { %v820_v34 = vrot.slane %v3981_v25, 5  ;;  %v823_v26 = vrot.slane %v3995_v46, 5  ;;  %v2062_v63 = vor.u32 %v2061_v1, %v2058_v51  ;;  %v2072_v11 = vor.u32 %v2071_v12, %v4223_v57  ;;  %v3583_v51 = vld [vmem:[%s3715_s11 + $0x54] sm:$0xff]   ;;  %v3080_v12 = vld [vmem:[%s3715_s11 + $0x48] sm:$0xf] }
  0x77   : > { %v4227_v35 = vsel %vm3918_vm7, %v815_v43, %v816_v45  ;;  %v2075_v45 = vshll.u32 %v4234_v15, 16  ;;  %v2085_v43 = vrot.slane %v2083_v22, 5  ;;  %v4266_v22 = vrot.slane %v2113_v60, 5 }
  0x78   : > { %v4252_v25 = vsel %vm3918_vm7, %v2906_v52, %v820_v34  ;;  %v822_v46 = vrot.slane %v820_v34, 4  ;;  %v2119_v52 = vrot.slane %v2117_v16, 4  ;;  %v2063_v34 = vrot.slane %v2062_v63, 4 }
  0x79   : > { %v1078_v61 = vsel %vm477_vm0, %v4095_v62, 0  ;;  %v2073_v60 = vrot.slane %v2072_v11, 4  ;;  %v2077_v2 = vrot.slane %v2075_v45, 5 }
  0x7a   : > { %3337 = vmatmul.mubr.msk.bf16.vlgmr.msra.gmra.mrb[0].mxu0 %vm452_vm4, %v3577_v41  ;;  %v2080_v41 = vshrl.u32 %v3071_v59, 16  ;;  %v2068_v11 = vsel %vm3760_vm3, %v2063_v34, %v4223_v57 }
  0x7b   : > { %3255 = vmatmul.mubr.msk.bf16.gmra.mrb[8].mxu1 %vm452_vm4, %v2888_v9  ;;  %3353 = vmatpush3.bf16.msra.mxu0 %v2298_v38  ;;  %v2089_v9 = vshll.u32 %v4210_v55, 16  ;;  %v2093_v38 = vshrl.u32 %v4210_v55, 16 }
  0x7c   : > { %3258 = vmatprep.mubr.msk.bf16.mxu1 %vm452_vm4, %v2889_v21  ;;  %3340 = vmatprep.mubr.msk.bf16.mxu0 %vm452_vm4, %v3579_v40  ;;  %v2104_v21 = vshrl.u32 %v3074_v48, 16  ;;  %v2107_v40 = vshll.u32 %v3074_v48, 16  ;;  %v2082_v59 = vrot.slane %v2080_v41, 4  ;;  %v4257_v48 = vld [vmem:[%s3715_s11 + $0x2c] sm:$0x1] }
  0x7d   : > { %3527 = vmatprep.subr.msk.bf16.mxu0 %vm477_vm0, %v4201_v44  ;;  %v4259_v3 = vrot.slane %v2089_v9, 5  ;;  %v4264_v41 = vld [vmem:[%s3715_s11 + $0x38] sm:$0x1]  ;;  %v2099_v16 = vshll.u32 %v4257_v48, 16  ;;  %v4286_v9 = vld [vmem:[%s3715_s11 + $0x4c] sm:$0xf] }
  0x7e   : > { %v2109_v1 = vrot.slane %v2107_v40, 5  ;;  %v4277_v40 = vld [vmem:[%s3715_s11 + $0x40] sm:$0xf]  ;;  %v2086_v39 = vor.u32 %v2085_v43, %v2082_v59  ;;  %v2123_v63 = vshll.u32 %v4264_v41, 16  ;;  %v2152_v59 = vshrl.u32 %v3080_v12, 16 }
  0x7f   : > { %v2137_v62 = vshll.u32 %v4277_v40, 16  ;;  %v2141_v45 = vshrl.u32 %v4277_v40, 16  ;;  %v2155_v43 = vshll.u32 %v3080_v12, 16  ;;  %v2165_v57 = vshrl.u32 %v4286_v9, 16 }
  0x80   : > { %v2087_v36 = vrot.slane %v2086_v39, 4  ;;  %v2154_v39 = vrot.slane %v2152_v59, 4  ;;  %v2189_v59 = vshrl.u32 %v4317_v33, 16 }
  0x82   : > { %3341 = vmatmul.mubr.msk.bf16.gmra.mrb[4].mxu0 %vm452_vm4, %v3581_v14  ;;  %v2095_v14 = vrot.slane %v2093_v38, 4  ;;  %v2120_v38 = vor.u32 %v2119_v52, %v4266_v22 }
  0x83   : > { %3259 = vmatmul.mubr.msk.bf16.gmra.mrb[12].mxu1 %vm452_vm4, %v2890_v47  ;;  %3344 = vmatprep.mubr.msk.bf16.mxu0 %vm452_vm4, %v3582_v20  ;;  %v2106_v47 = vrot.slane %v2104_v21, 4  ;;  %v3584_v20 = vld [vmem:[%s3715_s11 + $0x60] sm:$0xff]   ;;  %v3077_v21 = vld [vmem:[%s3715_s11 + $0x3c] sm:$0xf] }
  0x84   : > { %3264 = vmatprep.mubr.msk.bf16.mxu1 %vm452_vm4, %v2908_v53  ;;  %v4270_v53 = vsel %vm3918_vm7, %v822_v46, %v823_v26  ;;  %v2096_v26 = vor.u32 %v2095_v14, %v4259_v3  ;;  %v2128_v30 = vshrl.u32 %v3077_v21, 16  ;;  %v2131_v0 = vshll.u32 %v3077_v21, 16 }
  0x85   : > { %v2110_v46 = vor.u32 %v2109_v1, %v2106_v47  ;;  %v2078_v14 = vsel %vm3760_vm3, %v2073_v60, %v2077_v2  ;;  %v2101_v47 = vrot.slane %v2099_v16, 5  ;;  %v3083_v1 = vld [vmem:[%s3715_s11 + $0x54] sm:$0xf]  ;;  %v2125_v2 = vrot.slane %v2123_v63, 5 }
  0x86   : > { %v2130_v52 = vrot.slane %v2128_v30, 4  ;;  %v2133_v34 = vrot.slane %v2131_v0, 5  ;;  %v4310_v21 = vrot.slane %v2137_v62, 5  ;;  %v2157_v60 = vrot.slane %v2155_v43, 5  ;;  %v4323_v0 = vld [vmem:[%s3715_s11 + $0x50] sm:$0x1] }
  0x87   : > { %v2111_v12 = vrot.slane %v2110_v46, 4  ;;  %v3093_v30 = vcombine.low %v2068_v11, %v2078_v14  ;;  %v2179_v46 = vshll.u32 %v3083_v1, 16  ;;  %v2092_v63 = vsel %vm3760_vm3, %v2087_v36, %v4259_v3  ;;  %v3086_v43 = vld [vmem:[%s3715_s11 + $0x60] sm:$0xf]  ;;  %v4342_v3 = vld [vmem:[%s3715_s11 + $0x64] sm:$0xf] }
  0x88   : > { %v2171_v36 = vshll.u32 %v4323_v0, 16 }
  0x89   : > { %v2116_v11 = vsel %vm3760_vm3, %v2111_v12, %v4266_v22  ;;  %v4354_v12 = vld [vmem:[%s3715_s11 + $0x5c] sm:$0x1] }
  0x8a   : > { %3345 = vmatmul.mubr.msk.bf16.gmra.mrb[8].mxu0 %vm452_vm4, %v3583_v51  ;;  %v2161_v51 = vshll.u32 %v4286_v9, 16 }
  0x8b   : > { %3265 = vmatmul.mubr.msk.bf16.vlgmr.msra.gmra.mrb[0].mxu1 %vm452_vm4, %v2909_v27  ;;  %3348 = vmatprep.mubr.msk.bf16.mxu0 %vm452_vm4, %v3584_v20  ;;  %v2097_v27 = vrot.slane %v2096_v26, 4  ;;  %v2121_v20 = vrot.slane %v2120_v38, 4  ;;  %v2176_v38 = vshrl.u32 %v3083_v1, 16  ;;  %v2167_v26 = vrot.slane %v2165_v57, 4 }
  0x8c   : > { %3281 = vmatpush3.bf16.msra.mxu1 %v1078_v61  ;;  %3268 = vmatprep.mubr.msk.bf16.mxu1 %vm452_vm4, %v2910_v49  ;;  %v3594_v61 = vld [vmem:[%s4607_s1 + $0x8] sm:$0x3]  ;;  %v2143_v49 = vrot.slane %v2141_v45, 4  ;;  %v4325_v16 = vrot.slane %v2161_v51, 5  ;;  %v2185_v45 = vshll.u32 %v4317_v33, 16  ;;  %v2134_v51 = vor.u32 %v2133_v34, %v2130_v52 }
  0x8d   : > { %3523 = vmatprep.subr.msk.bf16.mxu1 %vm477_vm0, %v3594_v61  ;;  %v2102_v62 = vsel %vm3760_vm3, %v2097_v27, %v2101_v47  ;;  %v2126_v14 = vsel %vm3760_vm3, %v2121_v20, %v2125_v2  ;;  %v2147_v57 = vshll.u32 %v4320_v17, 16  ;;  %v2158_v1 = vor.u32 %v2157_v60, %v2154_v39 }
  0x8e   : > { %v2144_v47 = vor.u32 %v2143_v49, %v4310_v21  ;;  %v2178_v27 = vrot.slane %v2176_v38, 4  ;;  %v4618_v61 = vcombine.low %v4128_v58, %v4145_v28  ;;  %v2168_v22 = vor.u32 %v2167_v26, %v4325_v16 }
  0x8f   : > { %v2181_v2 = vrot.slane %v2179_v46, 5  ;;  %v2203_v20 = vshll.u32 %v3086_v43, 16  ;;  %v4619_v52 = vcombine.low %v4153_v37, %v4160_v8  ;;  %v4360_v34 = vrot.slane %v2185_v45, 5  ;;  %v3089_v45 = vld [vmem:[%s3715_s11 + $0x6c] sm:$0xf] }
  0x90   : > { %v2191_v58 = vrot.slane %v2189_v59, 4  ;;  %v2209_v28 = vshll.u32 %v4342_v3, 16  ;;  %v2213_v49 = vshrl.u32 %v4342_v3, 16  ;;  %v3094_v39 = vcombine.low %v2092_v63, %v2102_v62 }
  0x91   : > { %v2552_v60 = vsel %vm477_vm0, %v4201_v44, 0  ;;  %v3095_v38 = vcombine.low %v2116_v11, %v2126_v14  ;;  %v2135_v26 = vrot.slane %v2134_v51, 4  ;;  %v2145_v46 = vrot.slane %v2144_v47, 4  ;;  %v4381_v47 = vld [vmem:[%s3715_s11 + $0x68] sm:$0x1] }
  0x92   : > { %3349 = vmatmul.mubr.msk.bf16.gmra.mrb[12].mxu0 %vm452_vm4, %v3585_v50  ;;  %v2200_v50 = vshrl.u32 %v3086_v43, 16  ;;  %v2173_v37 = vrot.slane %v2171_v36, 5  ;;  %v2195_v8 = vshll.u32 %v4354_v12, 16  ;;  %v2159_v43 = vrot.slane %v2158_v1, 4 }
  0x93   : > { %3269 = vmatmul.mubr.msk.bf16.gmra.mrb[4].mxu1 %vm452_vm4, %v4618_v61  ;;  %3354 = vmatprep.mubr.msk.bf16.mxu0 %vm452_vm4, %v3093_v30  ;;  %v2149_v30 = vrot.slane %v2147_v57, 5  ;;  %v2182_v59 = vor.u32 %v2181_v2, %v2178_v27  ;;  %v2169_v18 = vrot.slane %v2168_v22, 4  ;;  %v2192_v63 = vor.u32 %v2191_v58, %v4360_v34 }
  0x94   : > { %3272 = vmatprep.mubr.msk.bf16.mxu1 %vm452_vm4, %v4619_v52  ;;  %v2202_v61 = vrot.slane %v2200_v50, 4  ;;  %v2205_v52 = vrot.slane %v2203_v20, 5  ;;  %v4372_v62 = vrot.slane %v2209_v28, 5  ;;  %v2215_v44 = vrot.slane %v2213_v49, 4 }
  0x95   : > { %v4620_v11 = vshll.u32 %v4036_v54, 16  ;;  %v4621_v51 = vshrl.u32 %v4036_v54, 16  ;;  %v2224_v1 = vshrl.u32 %v3089_v45, 16  ;;  %v2227_v36 = vshll.u32 %v3089_v45, 16 }
  0x96   : > { %v2140_v27 = vsel %vm3760_vm3, %v2135_v26, %v4310_v21  ;;  %v2150_v22 = vsel %vm3760_vm3, %v2145_v46, %v2149_v30  ;;  %v2233_v2 = vshll.u32 %v4369_v42, 16  ;;  %v2237_v50 = vshrl.u32 %v4369_v42, 16 }
  0x97   : > { %v4376_v14 = vrot.slane %v4620_v11, 5  ;;  %v1353_v57 = vrot.slane %v4621_v51, 4  ;;  %v4622_v54 = vcombine.low %v4169_v19, %v4181_v7  ;;  %v2164_v20 = vsel %vm3760_vm3, %v2159_v43, %v4325_v16  ;;  %v3586_v43 = vld [vmem:[%s3715_s11 + $0xc] sm:$0xff]  }
  0x98   : > { %v2183_v58 = vrot.slane %v2182_v59, 4  ;;  %v2197_v21 = vrot.slane %v2195_v8, 5  ;;  %v2206_v28 = vor.u32 %v2205_v52, %v2202_v61  ;;  %v4623_v49 = vcombine.low %v4214_v6, %v4227_v35  ;;  %v4409_v6 = vld [vmem:[%s3715_s11 + $0x74] sm:$0x1] }
  0x99   : > { %v2174_v19 = vsel %vm3760_vm3, %v2169_v18, %v2173_v37  ;;  %v2193_v7 = vrot.slane %v2192_v63, 4  ;;  %v1354_v16 = vor.u32 %v1353_v57, %v4376_v14  ;;  %v2226_v30 = vrot.slane %v2224_v1, 4  ;;  %v3109_v57 = vld [vmem:[%s3715_s11 + $0x18] sm:$0xe]  ;;  %v2974_v1 = vld [vmem:[%s3715_s11 + $0x48] sm:$0xf] }
  0x9a   : > { %3355 = vmatmul.mubr.msk.bf16.vlgmr.msra.gmra.mrb[0].mxu0 %vm452_vm4, %v3094_v39  ;;  %v2216_v39 = vor.u32 %v2215_v44, %v4372_v62  ;;  %v2229_v26 = vrot.slane %v2227_v36, 5  ;;  %v3096_v46 = vcombine.low %v2140_v27, %v2150_v22  ;;  %v4411_v35 = vrot.slane %v2233_v2, 5 }
  0x9b   : > { %3273 = vmatmul.mubr.msk.bf16.gmra.mrb[8].mxu1 %vm452_vm4, %v4622_v54  ;;  %3371 = vmatpush3.bf16.msra.mxu0 %v2552_v60  ;;  %v2219_v60 = vshll.u32 %v4381_v47, 16  ;;  %v4624_v8 = vshll.u32 %v4039_v56, 16  ;;  %v3097_v37 = vcombine.low %v2164_v20, %v2174_v19  ;;  %v2207_v45 = vrot.slane %v2206_v28, 4 }
  0x9c   : > { %3276 = vmatprep.mubr.msk.bf16.mxu1 %vm452_vm4, %v4623_v49  ;;  %3358 = vmatprep.mubr.msk.bf16.mxu0 %vm452_vm4, %v3095_v38  ;;  %v2239_v38 = vrot.slane %v2237_v50, 4  ;;  %v2188_v59 = vsel %vm3760_vm3, %v2183_v58, %v4360_v34  ;;  %v2198_v61 = vsel %vm3760_vm3, %v2193_v7, %v2197_v21  ;;  %v2217_v52 = vrot.slane %v2216_v39, 4  ;;  %v3587_v7 = vld [vmem:[%s3715_s11 + $0x18] sm:$0xff]  }
  0x9d   : > { %v1359_v18 = vrot.slane %v4624_v8, 5  ;;  %v2221_v63 = vrot.slane %v2219_v60, 5  ;;  %v1355_v44 = vrot.slane %v1354_v16, 4  ;;  %v2230_v11 = vor.u32 %v2229_v26, %v2226_v30  ;;  %v3588_v60 = vld [vmem:[%s3715_s11 + $0x24] sm:$0xff]   ;;  %v2971_v30 = vld [vmem:[%s3715_s11 + $0x3c] sm:$0xf] }
  0x9e   : > { %v2243_v51 = vshll.u32 %v4409_v6, 16  ;;  %v2240_v56 = vor.u32 %v2239_v38, %v4411_v35  ;;  %v2447_v36 = vrot.slane %v4177_v24, 5  ;;  %v4625_v34 = vcombine.low %v4252_v25, %v4270_v53 }
  0x9f   : > { %v3098_v27 = vcombine.low %v2188_v59, %v2198_v61  ;;  %v2212_v22 = vsel %vm3760_vm3, %v2207_v45, %v4372_v62  ;;  %v2222_v24 = vsel %vm3760_vm3, %v2217_v52, %v2221_v63  ;;  %v3117_v2 = vrot.slane %v3109_v57, 9  ;;  %v3110_v62 = vld [vmem:[%s3715_s11 + $0x24] sm:$0xe]  ;;  %v3589_v57 = vld [vmem:[%s3715_s11 + $0x30] sm:$0xff]  }
  0xa0   : > { %v1338_v25 = vshrl.u32 %v2974_v1, 16  ;;  %v1341_v53 = vshll.u32 %v2974_v1, 16  ;;  %v2231_v50 = vrot.slane %v2230_v11, 4  ;;  %v2245_v54 = vrot.slane %v2243_v51, 5 }
  0xa1   : > { %v2450_v20 = vrot.slane %v4234_v15, 5  ;;  %v1360_v58 = vsel %vm3760_vm3, %v1355_v44, %v1359_v18  ;;  %v2241_v21 = vrot.slane %v2240_v56, 4  ;;  %v2449_v28 = vrot.slane %v2447_v36, 4  ;;  %v3111_v44 = vld [vmem:[%s3715_s11 + $0x30] sm:$0xe] }
  0xa2   : > { %3359 = vmatmul.mubr.msk.bf16.gmra.mrb[4].mxu0 %vm452_vm4, %v3096_v46  ;;  %v1340_v49 = vrot.slane %v1338_v25, 4  ;;  %v1343_v19 = vrot.slane %v1341_v53, 5  ;;  %v3099_v39 = vcombine.low %v2212_v22, %v2222_v24  ;;  %v2454_v16 = vrot.slane %v4210_v55, 5  ;;  %v3112_v24 = vld [vmem:[%s3715_s11 + $0x3c] sm:$0xe] }
  0xa3   : > { %3277 = vmatmul.mubr.msk.bf16.gmra.mrb[12].mxu1 %vm452_vm4, %v4625_v34  ;;  %3362 = vmatprep.mubr.msk.bf16.mxu0 %vm452_vm4, %v3097_v37  ;;  %v2448_v46 = vsel %vm3918_vm7, %v3117_v2, %v2447_v36  ;;  %v3118_v38 = vrot.slane %v3110_v62, 9  ;;  %v2236_v15 = vsel %vm3760_vm3, %v2231_v50, %v4411_v35  ;;  %v2246_v8 = vsel %vm3760_vm3, %v2241_v21, %v2245_v54  ;;  %v3590_v36 = vld [vmem:[%s3715_s11 + $0x3c] sm:$0xff]   ;;  %v2977_v53 = vld [vmem:[%s3715_s11 + $0x54] sm:$0xf] }
  0xa4   : > { %3282 = vmatprep.mubr.msk.bf16.mxu1 %vm452_vm4, %v3586_v43  ;;  %v1344_v26 = vor.u32 %v1343_v19, %v1340_v49  ;;  %v2451_v18 = vsel %vm3918_vm7, %v2449_v28, %v2450_v20  ;;  %v1314_v37 = vshrl.u32 %v2971_v30, 16  ;;  %v1317_v45 = vshll.u32 %v2971_v30, 16  ;;  %v3591_v30 = vld [vmem:[%s3715_s11 + $0x48] sm:$0xff]  }
  0xa5   : > { %v1323_v43 = vshll.u32 %v4016_v5, 16  ;;  %v1327_v59 = vshrl.u32 %v4016_v5, 16  ;;  %v2456_v35 = vrot.slane %v2454_v16, 4  ;;  %v2457_v61 = vrot.slane %v4257_v48, 5 }
  0xa6   : > { %v1345_v55 = vrot.slane %v1344_v26, 4  ;;  %v2461_v52 = vrot.slane %v4230_v29, 5  ;;  %v3100_v51 = vcombine.low %v2236_v15, %v2246_v8  ;;  %v3126_v5 = vcombine.low %v2448_v46, %v2451_v18  ;;  %v3592_v8 = vld [vmem:[%s3715_s11 + $0x54] sm:$0xff]  }
  0xa7   : > { %v1316_v1 = vrot.slane %v1314_v37, 4  ;;  %v1319_v56 = vrot.slane %v1317_v45, 5  ;;  %v4473_v48 = vrot.slane %v1323_v43, 5  ;;  %v1329_v29 = vrot.slane %v1327_v59, 4  ;;  %v2980_v45 = vld [vmem:[%s3715_s11 + $0x60] sm:$0xf] }
  0xa8   : > { %v1350_v63 = vsel %vm3760_vm3, %v1345_v55, %v4376_v14  ;;  %v2458_v14 = vsel %vm3918_vm7, %v2456_v35, %v2457_v61  ;;  %v3119_v34 = vrot.slane %v3111_v44, 9  ;;  %v2464_v22 = vrot.slane %v4264_v41, 5  ;;  %v3113_v41 = vld [vmem:[%s3715_s11 + $0x48] sm:$0xe] }
  0xa9   : > { %v4468_v11 = vcombine.low %v1350_v63, %v1360_v58  ;;  %v2468_v2 = vrot.slane %v4277_v40, 5  ;;  %v2475_v25 = vrot.slane %v4286_v9, 5  ;;  %v1320_v54 = vor.u32 %v1319_v56, %v1316_v1 }
  0xaa   : > { %3363 = vmatmul.mubr.msk.bf16.gmra.mrb[8].mxu0 %vm452_vm4, %v3098_v27  ;;  %v2463_v27 = vrot.slane %v2461_v52, 4  ;;  %v1330_v20 = vor.u32 %v1329_v29, %v4473_v48  ;;  %v1333_v58 = vshll.u32 %v4019_v23, 16  ;;  %v2462_v40 = vsel %vm3918_vm7, %v3119_v34, %v2461_v52  ;;  %v3114_v52 = vld [vmem:[%s3715_s11 + $0x54] sm:$0xe] }
  0xab   : > { %3283 = vmatmul.mubr.msk.bf16.vlgmr.msra.gmra.mrb[0].mxu1 %vm452_vm4, %v3587_v7  ;;  %3366 = vmatprep.mubr.msk.bf16.mxu0 %vm452_vm4, %v3099_v39  ;;  %v3120_v21 = vrot.slane %v3112_v24, 9  ;;  %v2471_v28 = vrot.slane %v4320_v17, 5  ;;  %v1362_v62 = vshrl.u32 %v2977_v53, 16  ;;  %v1365_v49 = vshll.u32 %v2977_v53, 16 }
  0xac   : > { %3389 = vmatpush3.bf16.msra.mxu1 %v3712_v4  ;;  %3286 = vmatprep.mubr.msk.bf16.mxu1 %vm452_vm4, %v3588_v60  ;;  %v2455_v4 = vsel %vm3918_vm7, %v3118_v38, %v2454_v16  ;;  %v2465_v9 = vsel %vm3918_vm7, %v2463_v27, %v2464_v22  ;;  %v1371_v19 = vshll.u32 %v4049_v13, 16  ;;  %v1375_v23 = vshrl.u32 %v4049_v13, 16 }
  0xad   : > { %v3127_v50 = vcombine.low %v2455_v4, %v2458_v14  ;;  %v2470_v7 = vrot.slane %v2468_v2, 4  ;;  %v3121_v39 = vrot.slane %v3113_v41, 9  ;;  %v2477_v60 = vrot.slane %v2475_v25, 4 }
  0xae   : > { %v2478_v16 = vrot.slane %v4323_v0, 5  ;;  %v3128_v26 = vcombine.low %v2462_v40, %v2465_v9  ;;  %v1321_v46 = vrot.slane %v1320_v54, 4  ;;  %v1331_v38 = vrot.slane %v1330_v20, 4 }
  0xaf   : > { %v1335_v15 = vrot.slane %v1333_v58, 5  ;;  %v1364_v17 = vrot.slane %v1362_v62, 4  ;;  %v1367_v18 = vrot.slane %v1365_v49, 5  ;;  %v1373_v55 = vrot.slane %v1371_v19, 5  ;;  %v4627_v19 = vld [vmem:[#allocation3_spill] sm:$0xff] }
  0xb0   : > { %v1377_v37 = vrot.slane %v1375_v23, 4  ;;  %v2469_v13 = vsel %vm3918_vm7, %v3120_v21, %v2468_v2  ;;  %v2472_v0 = vsel %vm3918_vm7, %v2470_v7, %v2471_v28  ;;  %v2476_v43 = vsel %vm3918_vm7, %v3121_v39, %v2475_v25  ;;  %v3116_v7 = vld [vmem:[%s3715_s11 + $0x6c] sm:$0xe] }
  0xb1   : > { %v2479_v59 = vsel %vm3918_vm7, %v2477_v60, %v2478_v16  ;;  %v1326_v35 = vsel %vm3760_vm3, %v1321_v46, %v4473_v48  ;;  %v1336_v61 = vsel %vm3760_vm3, %v1331_v38, %v1335_v15  ;;  %v2482_v63 = vrot.slane %v4317_v33, 5 }
  0xb2   : > { %3367 = vmatmul.mubr.msk.bf16.gmra.mrb[12].mxu0 %vm452_vm4, %v3100_v51  ;;  %v2489_v44 = vrot.slane %v4342_v3, 5  ;;  %v3115_v51 = vld [vmem:[%s3715_s11 + $0x60] sm:$0xe]  ;;  %v1389_v4 = vshll.u32 %v2980_v45, 16  ;;  %v1399_v1 = vshrl.u32 %v4056_v32, 16  ;;  %v3129_v56 = vcombine.low %v2469_v13, %v2472_v0 }
  0xb3   : > { %3287 = vmatmul.mubr.msk.bf16.gmra.mrb[4].mxu1 %vm452_vm4, %v3589_v57  ;;  %3372 = vmatprep.mubr.msk.bf16.mxu0 %vm452_vm4, %v3126_v5  ;;  %v1386_v5 = vshrl.u32 %v2980_v45, 16  ;;  %v1395_v57 = vshll.u32 %v4056_v32, 16  ;;  %v1368_v48 = vor.u32 %v1367_v18, %v1364_v17  ;;  %v1378_v29 = vor.u32 %v1377_v37, %v1373_v55  ;;  %v3593_v3 = vld [vmem:[%s3715_s11 + $0x60] sm:$0xff]  }
  0xb4   : > { %3290 = vmatprep.mubr.msk.bf16.mxu1 %vm452_vm4, %v3590_v36  ;;  %v4626_v36 = vld [vmem:[#allocation2_spill] sm:$0xff]  ;;  %v2988_v34 = vcombine.low %v1326_v35, %v1336_v61  ;;  %v3130_v27 = vcombine.low %v2476_v43, %v2479_v59  ;;  %v3122_v33 = vrot.slane %v3114_v52, 9  ;;  %v2485_v22 = vrot.slane %v4354_v12, 5 }
  0xb5   : > { %v1381_v14 = vshll.u32 %v4626_v36, 16  ;;  %v2484_v24 = vrot.slane %v2482_v63, 4  ;;  %v3123_v2 = vrot.slane %v3115_v51, 9  ;;  %v2491_v25 = vrot.slane %v2489_v44, 4 }
  0xb6   : > { %v2492_v53 = vrot.slane %v4381_v47, 5  ;;  %v1391_v54 = vrot.slane %v1389_v4, 5  ;;  %v1397_v20 = vrot.slane %v1395_v57, 5  ;;  %v1401_v32 = vrot.slane %v1399_v1, 4 }
  0xb7   : > { %v1369_v58 = vrot.slane %v1368_v48, 4  ;;  %v1379_v41 = vrot.slane %v1378_v29, 4  ;;  %v1383_v40 = vrot.slane %v1381_v14, 5  ;;  %v2483_v12 = vsel %vm3918_vm7, %v3122_v33, %v2482_v63 }
  0xb8   : > { %v2486_v47 = vsel %vm3918_vm7, %v2484_v24, %v2485_v22  ;;  %v2490_v9 = vsel %vm3918_vm7, %v3123_v2, %v2489_v44  ;;  %v2496_v21 = vrot.slane %v4369_v42, 5  ;;  %v2493_v28 = vsel %vm3918_vm7, %v2491_v25, %v2492_v53 }
  0xb9   : > { %v1402_v49 = vor.u32 %v1401_v32, %v1397_v20  ;;  %v1405_v23 = vshll.u32 %v4627_v19, 16  ;;  %v1374_v39 = vsel %vm3760_vm3, %v1369_v58, %v1373_v55  ;;  %v1384_v60 = vsel %vm3760_vm3, %v1379_v41, %v1383_v40 }
  0xba   : > { %3373 = vmatmul.mubr.msk.bf16.vlgmr.msra.gmra.mrb[0].mxu0 %vm452_vm4, %v3127_v50  ;;  %v1388_v50 = vrot.slane %v1386_v5, 4  ;;  %v3131_v16 = vcombine.low %v2483_v12, %v2486_v47  ;;  %v2498_v42 = vrot.slane %v2496_v21, 4  ;;  %v2499_v46 = vrot.slane %v4409_v6, 5 }
  0xbb   : > { %3291 = vmatmul.mubr.msk.bf16.gmra.mrb[8].mxu1 %vm452_vm4, %v3591_v30  ;;  %3376 = vmatprep.mubr.msk.bf16.mxu0 %vm452_vm4, %v3128_v26  ;;  %v3132_v30 = vcombine.low %v2490_v9, %v2493_v28  ;;  %v3124_v26 = vrot.slane %v3116_v7, 9  ;;  %v2990_v38 = vcombine.low %v1374_v39, %v1384_v60  ;;  %v1407_v17 = vrot.slane %v1405_v23, 5 }
  0xbc   : > { %3294 = vmatprep.mubr.msk.bf16.mxu1 %vm452_vm4, %v3592_v8  ;;  %v1392_v62 = vor.u32 %v1391_v54, %v1388_v50  ;;  %v1403_v8 = vrot.slane %v1402_v49, 4  ;;  %v2500_v55 = vsel %vm3918_vm7, %v2498_v42, %v2499_v46 }
  0xbd   : > { %v2497_v18 = vsel %vm3918_vm7, %v3124_v26, %v2496_v21 }
  0xbe   : > { %v1393_v15 = vrot.slane %v1392_v62, 4  ;;  %v1408_v37 = vsel %vm3760_vm3, %v1403_v8, %v1407_v17  ;;  %v3133_v45 = vcombine.low %v2497_v18, %v2500_v55 }
  0xc0   : > { %v1398_v6 = vsel %vm3760_vm3, %v1393_v15, %v1397_v20 }
  0xc1   : > { %v2991_v13 = vcombine.low %v1398_v6, %v1408_v37 }
  0xc2   : > { %3377 = vmatmul.mubr.msk.bf16.gmra.mrb[4].mxu0 %vm452_vm4, %v3129_v56 }
  0xc3   : > { %3295 = vmatmul.mubr.msk.bf16.gmra.mrb[12].mxu1 %vm452_vm4, %v3593_v3  ;;  %3380 = vmatprep.mubr.msk.bf16.mxu0 %vm452_vm4, %v3130_v27 }
  0xc4   : > { %3308 = vmatprep.mubr.msk.bf16.mxu1 %vm452_vm4, %v2988_v34 }
  0xca   : > { %3381 = vmatmul.mubr.msk.bf16.gmra.mrb[8].mxu0 %vm452_vm4, %v3131_v16 }
  0xcb   : > { %3309 = vmatmul.mubr.msk.bf16.vlgmr.msra.gmra.mrb[8].mxu1 %vm452_vm4, %v4468_v11  ;;  %3384 = vmatprep.mubr.msk.bf16.mxu0 %vm452_vm4, %v3132_v30 }
  0xcc   : > { %3312 = vmatprep.mubr.msk.bf16.mxu1 %vm452_vm4, %v2990_v38 }
  0xd2   : > { %3385 = vmatmul.mubr.msk.bf16.gmra.mrb[12].mxu0 %vm452_vm4, %v3133_v45 }
  0xd3   : > { %3313 = vmatmul.mubr.msk.bf16.gmra.mrb[12].mxu1 %vm452_vm4, %v2991_v13 }
 0x17e   : > { %v3284_v11 = vpop.f32.mrb[0].mxu1 }
 0x17f   : > { %v1114_v0 = vpop.f32.mrb[1].mxu1 }
 0x180   : > { %v3285_v10 = vpop.f32.mrb[2].mxu1 }
 0x181   : > { %v1117_v43 = vpop.f32.mrb[3].mxu1 }
 0x186   : > { %v3288_v59 = vpop.f32.mrb[4].mxu1 }
 0x187   : > { %v1130_v35 = vpop.f32.mrb[5].mxu1 }
 0x188   : > { %v3289_v61 = vpop.f32.mrb[6].mxu1 }
 0x189   : > { %v1133_v52 = vpop.f32.mrb[7].mxu1 }
 0x18d   : > { %v3374_v31 = vpop.f32.mrb[0].mxu0 }
 0x18e   : > { %v3390_v63 = vadd.f32 %v3374_v31, %v3284_v11  ;;  %v2588_v44 = vpop.f32.mrb[1].mxu0 }
 0x18f   : > { %v3391_v51 = vadd.f32 %v2588_v44, %v1114_v0  ;;  %v3375_v5 = vpop.f32.mrb[2].mxu0 }
 0x190   : > { %2669 = vst [vmem:[%s3696_s30 + $0x10] sm:$0xff] %v3390_v63  ;;  %v3392_v4 = vadd.f32 %v3375_v5, %v3285_v10  ;;  %v2591_v57 = vpop.f32.mrb[3].mxu0  ;;  %v2710_v36 = vmul.f32 %v3390_v63, %v3390_v63 }
 0x191   : > { %2667 = vst [vmem:[%s3696_s30] sm:$0xff] %v3391_v51  ;;  %v3393_v1 = vadd.f32 %v2591_v57, %v1117_v43  ;;  %v2708_v56 = vmul.f32 %v3391_v51, %v3391_v51 }
 0x192   : > { %2670 = vst [vmem:[%s3696_s30 + $0x18] sm:$0xff] %v3392_v4  ;;  %v2711_v3 = vmul.f32 %v3392_v4, %v3392_v4 }
 0x193   : > { %2668 = vst [vmem:[%s3696_s30 + $0x8] sm:$0xff] %v3393_v1  ;;  %v2684_v48 = vadd.f32 %v3393_v1, %v3391_v51  ;;  %v2709_v29 = vmul.f32 %v3393_v1, %v3393_v1 }
 0x195   : > { %v2685_v14 = vadd.f32 %v3390_v63, %v2684_v48  ;;  %v2724_v34 = vadd.f32 %v2709_v29, %v2708_v56  ;;  %v3378_v27 = vpop.f32.mrb[4].mxu0 }
 0x196   : > { %v3394_v33 = vadd.f32 %v3378_v27, %v3288_v59  ;;  %v2604_v22 = vpop.f32.mrb[5].mxu0 }
 0x197   : > { %v2725_v24 = vadd.f32 %v2724_v34, %v2710_v36  ;;  %v3395_v2 = vadd.f32 %v2604_v22, %v1130_v35  ;;  %v2686_v25 = vadd.f32 %v3392_v4, %v2685_v14  ;;  %v3379_v53 = vpop.f32.mrb[6].mxu0 }
 0x198   : > { %2673 = vst [vmem:[%s3696_s30 + $0x30] sm:$0xff] %v3394_v33  ;;  %v3396_v50 = vadd.f32 %v3379_v53, %v3289_v61  ;;  %v2607_v54 = vpop.f32.mrb[7].mxu0  ;;  %v2714_v9 = vmul.f32 %v3394_v33, %v3394_v33 }
 0x199   : > { %2671 = vst [vmem:[%s3696_s30 + $0x20] sm:$0xff] %v3395_v2  ;;  %v2687_v20 = vadd.f32 %v3395_v2, %v2686_v25  ;;  %v2712_v32 = vmul.f32 %v3395_v2, %v3395_v2  ;;  %v2726_v58 = vadd.f32 %v2725_v24, %v2711_v3  ;;  %v3397_v41 = vadd.f32 %v2607_v54, %v1133_v52 }
 0x19a   : > { %2674 = vst [vmem:[%s3696_s30 + $0x38] sm:$0xff] %v3396_v50  ;;  %v2715_v23 = vmul.f32 %v3396_v50, %v3396_v50 }
 0x19b   : > { %v2727_v40 = vadd.f32 %v2726_v58, %v2712_v32  ;;  %2672 = vst [vmem:[%s3696_s30 + $0x28] sm:$0xff] %v3397_v41  ;;  %v2688_v12 = vadd.f32 %v3397_v41, %v2687_v20  ;;  %v2713_v47 = vmul.f32 %v3397_v41, %v3397_v41 }
 0x19d   : > { %v2689_v21 = vadd.f32 %v3394_v33, %v2688_v12  ;;  %v2728_v28 = vadd.f32 %v2727_v40, %v2713_v47  ;;  %v3382_v62 = vpop.f32.mrb[8].mxu0 }
 0x19e   : > { %v3310_v49 = vpop.f32.mrb[8].mxu1  ;;  %v2620_v19 = vpop.f32.mrb[9].mxu0 }
 0x19f   : > { %v2729_v7 = vadd.f32 %v2728_v28, %v2714_v9  ;;  %v3398_v39 = vadd.f32 %v3382_v62, %v3310_v49  ;;  %v1528_v60 = vpop.f32.mrb[9].mxu1  ;;  %v2690_v16 = vadd.f32 %v3396_v50, %v2689_v21  ;;  %v3383_v30 = vpop.f32.mrb[10].mxu0  ;;  %v2683_v9 = vld [vmem:[%s4609_s3] sm:$0x1]  ;;  %v2707_v62 = vld [vmem:[%s4609_s3 + $0x1] sm:$0x1] }
 0x1a0   : > { %v3399_v26 = vadd.f32 %v2620_v19, %v1528_v60  ;;  %v3311_v42 = vpop.f32.mrb[10].mxu1  ;;  %v2623_v46 = vpop.f32.mrb[11].mxu0 }
 0x1a1   : > { %2677 = vst [vmem:[%s3696_s30 + $0x50] sm:$0xff] %v3398_v39  ;;  %v2730_v38 = vadd.f32 %v2729_v7, %v2715_v23  ;;  %v3400_v15 = vadd.f32 %v3383_v30, %v3311_v42  ;;  %v1531_v8 = vpop.f32.mrb[11].mxu1  ;;  %v2718_v11 = vmul.f32 %v3398_v39, %v3398_v39 }
 0x1a2   : > { %2675 = vst [vmem:[%s3696_s30 + $0x40] sm:$0xff] %v3399_v26  ;;  %v2691_v17 = vadd.f32 %v3399_v26, %v2690_v16  ;;  %v2716_v18 = vmul.f32 %v3399_v26, %v3399_v26  ;;  %v3401_v55 = vadd.f32 %v2623_v46, %v1531_v8 }
 0x1a3   : > { %2678 = vst [vmem:[%s3696_s30 + $0x58] sm:$0xff] %v3400_v15  ;;  %v2719_v31 = vmul.f32 %v3400_v15, %v3400_v15 }
 0x1a4   : > { %v2731_v6 = vadd.f32 %v2730_v38, %v2716_v18  ;;  %2676 = vst [vmem:[%s3696_s30 + $0x48] sm:$0xff] %v3401_v55  ;;  %v2692_v37 = vadd.f32 %v3401_v55, %v2691_v17  ;;  %v2717_v45 = vmul.f32 %v3401_v55, %v3401_v55 }
 0x1a5   : > { %v3386_v13 = vpop.f32.mrb[12].mxu0 }
 0x1a6   : > { %v2693_v0 = vadd.f32 %v3398_v39, %v2692_v37  ;;  %v2732_v10 = vadd.f32 %v2731_v6, %v2717_v45  ;;  %v3314_v43 = vpop.f32.mrb[12].mxu1  ;;  %v2636_v59 = vpop.f32.mrb[13].mxu0 }
 0x1a7   : > { %v3402_v35 = vadd.f32 %v3386_v13, %v3314_v43  ;;  %v1544_v61 = vpop.f32.mrb[13].mxu1  ;;  %v3387_v52 = vpop.f32.mrb[14].mxu0 }
 0x1a8   : > { %v2733_v63 = vadd.f32 %v2732_v10, %v2718_v11  ;;  %v3403_v44 = vadd.f32 %v2636_v59, %v1544_v61  ;;  %v2694_v51 = vadd.f32 %v3400_v15, %v2693_v0  ;;  %v3315_v5 = vpop.f32.mrb[14].mxu1  ;;  %v2639_v4 = vpop.f32.mrb[15].mxu0 }
 0x1a9   : > { %2681 = vst [vmem:[%s3696_s30 + $0x70] sm:$0xff] %v3402_v35  ;;  %v3404_v57 = vadd.f32 %v3387_v52, %v3315_v5  ;;  %v1547_v1 = vpop.f32.mrb[15].mxu1  ;;  %v2722_v33 = vmul.f32 %v3402_v35, %v3402_v35 }
 0x1aa   : > { %2679 = vst [vmem:[%s3696_s30 + $0x60] sm:$0xff] %v3403_v44  ;;  %v2695_v56 = vadd.f32 %v3403_v44, %v2694_v51  ;;  %v2720_v48 = vmul.f32 %v3403_v44, %v3403_v44  ;;  %v2734_v29 = vadd.f32 %v2733_v63, %v2719_v31  ;;  %v3405_v36 = vadd.f32 %v2639_v4, %v1547_v1 }
 0x1ab   : > { %2682 = vst [vmem:[%s3696_s30 + $0x78] sm:$0xff] %v3404_v57  ;;  %v2723_v24 = vmul.f32 %v3404_v57, %v3404_v57 }
 0x1ac   : > { %v2735_v14 = vadd.f32 %v2734_v29, %v2720_v48  ;;  %2680 = vst [vmem:[%s3696_s30 + $0x68] sm:$0xff] %v3405_v36  ;;  %v2696_v34 = vadd.f32 %v3405_v36, %v2695_v56  ;;  %v2721_v27 = vmul.f32 %v3405_v36, %v3405_v36 }
 0x1ae   : > { %v2697_v22 = vadd.f32 %v3402_v35, %v2696_v34  ;;  %v2736_v3 = vadd.f32 %v2735_v14, %v2721_v27 }
 0x1b0   : > { %v2698_v2 = vadd.f32 %v3404_v57, %v2697_v22  ;;  %v2737_v25 = vadd.f32 %v2736_v3, %v2722_v33 }
 0x1b2   : > { %v2699_v53 = vrot.slane %v2698_v2, 4  ;;  %v2738_v50 = vadd.f32 %v2737_v25, %v2723_v24 }
 0x1b4   : > { %v2700_v54 = vadd.f32 %v2699_v53, %v2698_v2  ;;  %v2739_v20 = vrot.slane %v2738_v50, 4 }
 0x1b6   : > { %v2701_v32 = vrot.slane %v2700_v54, 2  ;;  %v2740_v58 = vadd.f32 %v2739_v20, %v2738_v50 }
 0x1b8   : > { %v2702_v41 = vadd.f32 %v2701_v32, %v2700_v54  ;;  %v2741_v40 = vrot.slane %v2740_v58, 2 }
 0x1ba   : > { %v2703_v12 = vrot.slane %v2702_v41, 1  ;;  %v2742_v47 = vadd.f32 %v2741_v40, %v2740_v58 }
 0x1bc   : > { %v2704_v21 = vadd.f32 %v2703_v12, %v2702_v41  ;;  %v2743_v28 = vrot.slane %v2742_v47, 1 }
 0x1be   : > { %v2705_v49 = vadd.f32 %v2704_v21, %v2683_v9  ;;  %v2744_v19 = vadd.f32 %v2743_v28, %v2742_v47 }
 0x1c0   : > { %2706 = vst [vmem:[%s4609_s3] sm:$0x1] %v2705_v49  ;;  %v2745_v23 = vadd.f32 %v2744_v19, %v2707_v62 }
 0x1c2   : > { %2746 = vst [vmem:[%s4609_s3 + $0x1] sm:$0x1] %v2745_v23 }
 0x1c3 PF: > { %s14_s16 = sadd.s32 1, %s3633_s16   ;;  %s4628_s12 = smov %s3625_s14 }
 0x1c4   : > { %p11_p10 = scmp.ge.s32.totalorder %s14_s16, 6   ;;  %s4629_s13 = smov %s3629_s15 }
 0x1c5   : > { %s4630_s14 = smov %s4633_s17  ;;  %s4631_s15 = smov %s4637_s18 }
 0x1c6   :  { %13 = sbr.rel (!%p11_p10) target bundleno = 3 (0x3), region = 81 }

</bundles_post_ra>
